<compile_context>
chip_gen: v7x
topology: tpu7x:2x2x1
jax: 0.10.0
libtpu: 0.0.40
codegen_flags: <defaults>
</compile_context>

<pallas_src>
import functools
import numpy as np
import jax
import jax.numpy as jnp
from jax import lax
from jax.experimental import pallas as pl
from jax.experimental.pallas import tpu as pltpu


# ----------------------- one-time weight preparation ------------------------ #

def _conv1_banded(w, w_in, pw_out):
    """Banded matrices for conv1 with the 2x2-pool W-parity folded into the
    columns and the input-row parity folded into a lane-packed K.

    Input rows are stored pair-packed along lanes: row 2*hp in lanes
    [0, W*Cin), row 2*hp+1 in lanes [W*Cin, 2*W*Cin).

    Returns (2, KH, 2*w_in*Cin, 2*pw_out*Cout) with
      m[a, di, par*w_in*Cin + w*Cin + ci, b*pw_out*Cout + pw*Cout + co]
        = w[co, ci, di, w - (2*pw + b)]            (if in range)
    where par = (a + di) % 2 selects which half of the row pair carries input
    row (2*ph + a + di) for H-pool parity a.
    """
    cout, cin, kh, kw = w.shape
    wt = np.transpose(np.asarray(w, np.float32), (2, 3, 1, 0))   # (kh,kw,cin,cout)
    m = np.zeros((2, kh, 2 * w_in * cin, 2 * pw_out * cout), np.float32)
    for a in range(2):
        for di in range(kh):
            par = (a + di) % 2
            for b in range(2):
                for pw in range(pw_out):
                    for dj in range(kw):
                        col_w = 2 * pw + b + dj
                        if col_w >= w_in:
                            continue
                        r0 = par * w_in * cin + col_w * cin
                        c0 = b * pw_out * cout + pw * cout
                        m[a, di, r0:r0 + cin, c0:c0 + cout] = wt[di, dj]
    return jnp.asarray(m)


def _conv2_banded(w, w_in, pw_out):
    """(KH, w_in*Cin, 2*pw_out*Cout): W-pool parity folded into columns."""
    cout, cin, kh, kw = w.shape
    wt = np.transpose(np.asarray(w, np.float32), (2, 3, 1, 0))
    m = np.zeros((kh, w_in * cin, 2 * pw_out * cout), np.float32)
    for di in range(kh):
        for b in range(2):
            for pw in range(pw_out):
                for dj in range(kw):
                    col_w = 2 * pw + b + dj
                    if col_w >= w_in:
                        continue
                    m[di, col_w * cin:(col_w + 1) * cin,
                      b * pw_out * cout + pw * cout:
                      b * pw_out * cout + (pw + 1) * cout] = wt[di, dj]
    return jnp.asarray(m)


def prepare_params(params, inp_shape):
    """Hoisted one-time weight preprocessing (banded conv matrices + FC^T)."""
    C, H, W = inp_shape
    K1 = params["conv1"].shape[2]
    PW1 = (W - K1 + 1) // 2
    K2 = params["conv2"].shape[2]
    PW2 = (PW1 - K2 + 1) // 2
    # TODO(synk): cast m1/m2/fc*_t to bf16 once the kernel is MXU-bound; kept
    # f32 here so the output matches the f32 reference to 1e-4.
    return dict(
        m1=_conv1_banded(params["conv1"], W, PW1),     # (2, 5, 2*W*C, 2*PW1*10)
        m2=_conv2_banded(params["conv2"], PW1, PW2),   # (5, PW1*10, 2*PW2*20)
        fc1=jnp.asarray(params["fc1"]).T,              # (num_flat, 128)
        fc2=jnp.asarray(params["fc2"]).T,              # (128, 64)
        fc3=jnp.asarray(params["fc3"]).T,              # (64, 10)
    )


# ------------------------------ fused forward ------------------------------- #

def _round_up(x, m):
    return (x + m - 1) // m * m


@functools.partial(jax.jit, static_argnames=("block_batch",))
def cnn_small_forward(x_nchw, m1, m2, fc1_t, fc2_t, fc3_t, block_batch=256):
    N, C, H, W = x_nchw.shape
    K1 = m1.shape[1]
    OH1, OW1 = H - K1 + 1, W - K1 + 1
    assert OH1 % 2 == 0 and OW1 % 2 == 0
    PH1, PW1 = OH1 // 2, OW1 // 2
    half1 = m1.shape[3] // 2               # PW1 * C1out
    C1out = half1 // PW1
    K2 = m2.shape[0]
    OH2, OW2 = PH1 - K2 + 1, PW1 - K2 + 1
    # TODO(synk): kernel and fc1-flatten order assume the second pooled feature
    # map is 1x1 spatial (true for CNNsmall with 16x16 inputs); generalize for
    # other input sizes.
    assert OH2 == 2 and OW2 == 2
    C2out = m2.shape[2] // 2
    n_out = fc3_t.shape[1]

    H2 = H // 2
    L = 2 * W * C                          # lanes per packed row-pair (=128 here)

    # Batch blocking: batch becomes the matmul M dimension inside the kernel.
    # NB is a multiple of 8 so the in-kernel (PH1, NB, L) -> (PH1*NB, L)
    # reshape is layout-free.  For large N this gives grid length >= 2 so v7x
    # can shard the "parallel" axis over both TensorCores.
    NB = min(_round_up(block_batch, 8), _round_up(N, 8))
    NPAD = _round_up(N, NB)
    NBLK = NPAD // NB

    # NCHW -> (N, H/2, 2*W*C): channel-last, row pairs packed along lanes
    # (even row in lanes [0, W*C), odd row in lanes [W*C, 2*W*C)).
    x = jnp.transpose(x_nchw, (0, 2, 3, 1)).reshape(N, H2, L)
    x = jnp.pad(x, ((0, NPAD - N), (0, 0), (0, 0)))
    # (NBLK, H/2, NB, L): batch is second-minor within each block.
    x = x.reshape(NBLK, NB, H2, L).transpose(0, 2, 1, 3)

    def kernel(x_ref, m1_ref, m2_ref, w1_ref, w2_ref, w3_ref, o_ref):
        f32 = jnp.float32

        # Distinct H-direction slab starts: hp0 = (a + di) // 2 in [0, K1//2].
        slabs = [x_ref[0, h:h + PH1, :, :].reshape(PH1 * NB, L)
                 for h in range(K1 // 2 + 1)]

        # ---- conv1 + ReLU + 2x2 maxpool (fully fused, batch in M) ---------- #
        pooled1 = None
        for a in (0, 1):                               # H-pool parity
            acc = jnp.zeros((PH1 * NB, 2 * half1), f32)
            for di in range(K1):                       # H-direction taps
                acc = acc + jnp.dot(slabs[(a + di) // 2], m1_ref[a, di],
                                    preferred_element_type=f32)
            cand = jnp.maximum(acc[:, :half1], acc[:, half1:])   # W-pool parity
            pooled1 = cand if pooled1 is None else jnp.maximum(pooled1, cand)
        pooled1 = jnp.maximum(pooled1, 0.0)            # (PH1*NB, PW1*C1out)

        # ---- conv2 + ReLU + 2x2 maxpool (pooled output is 1x1 spatial) ----- #
        acc2 = jnp.zeros((2 * NB, 2 * C2out), f32)     # rows: [oh2=0 | oh2=1]
        for di in range(K2):
            rows = pooled1[di * NB:(di + 2) * NB, :]   # ph in {di, di+1}
            acc2 = acc2 + jnp.dot(rows, m2_ref[di], preferred_element_type=f32)
        cand2 = jnp.maximum(acc2[:, :C2out], acc2[:, C2out:])    # W-pool parity
        p2 = jnp.maximum(jnp.maximum(cand2[:NB], cand2[NB:]), 0.0)  # (NB, C2out)

        # ---- fc1 -> ReLU -> fc2 -> ReLU -> fc3 (batch in M, VMEM resident) -- #
        h = jnp.maximum(jnp.dot(p2, w1_ref[...], preferred_element_type=f32), 0.0)
        h = jnp.maximum(jnp.dot(h, w2_ref[...], preferred_element_type=f32), 0.0)
        o_ref[...] = jnp.dot(h, w3_ref[...], preferred_element_type=f32)

    grid_spec = pltpu.PrefetchScalarGridSpec(
        num_scalar_prefetch=0,
        grid=(NBLK,),
        in_specs=[
            pl.BlockSpec((1, H2, NB, L), lambda b: (b, 0, 0, 0)),
            pl.BlockSpec(m1.shape, lambda b: (0, 0, 0, 0)),
            pl.BlockSpec(m2.shape, lambda b: (0, 0, 0)),
            pl.BlockSpec(fc1_t.shape, lambda b: (0, 0)),
            pl.BlockSpec(fc2_t.shape, lambda b: (0, 0)),
            pl.BlockSpec(fc3_t.shape, lambda b: (0, 0)),
        ],
        out_specs=pl.BlockSpec((NB, n_out), lambda b: (b, 0)),
    )
    out = pl.pallas_call(
        kernel,
        out_shape=jax.ShapeDtypeStruct((NPAD, n_out), jnp.float32),
        grid_spec=grid_spec,
        compiler_params=pltpu.CompilerParams(
            dimension_semantics=("parallel",)),
    )(x, m1, m2, fc1_t, fc2_t, fc3_t)
    return out[:N]


# --------------------------- params / reference ---------------------------- #

def init_params(key, inp_shape):
    """inp_shape = [C, H, W]; deterministic synthetic weights (PyTorch shapes)."""
    C, H, W = inp_shape
    k1, k2, k3, k4, k5 = jax.random.split(key, 5)
    h, w = (H - 4) // 2, (W - 4) // 2
    h, w = (h - 4) // 2, (w - 4) // 2
    num_flat_features = 20 * h * w
    return {
        "conv1": 0.1 * jax.random.normal(k1, (10, C, 5, 5), jnp.float32),
        "conv2": 0.1 * jax.random.normal(k2, (20, 10, 5, 5), jnp.float32),
        "fc1": 0.1 * jax.random.normal(k3, (128, num_flat_features), jnp.float32),
        "fc2": 0.1 * jax.random.normal(k4, (64, 128), jnp.float32),
        "fc3": 0.1 * jax.random.normal(k5, (10, 64), jnp.float32),
    }


def reference_forward(x, p):
    """Pure-JAX reference mirroring the PyTorch forward (NCHW)."""
    def conv(x, w):
        return lax.conv_general_dilated(
            x, w, window_strides=(1, 1), padding="VALID",
            dimension_numbers=("NCHW", "OIHW", "NCHW"))

    def pool(x):
        return lax.reduce_window(x, -jnp.inf, lax.max,
                                 (1, 1, 2, 2), (1, 1, 2, 2), "VALID")

    x = pool(jax.nn.relu(conv(x, p["conv1"])))
    x = pool(jax.nn.relu(conv(x, p["conv2"])))
    x = x.reshape(x.shape[0], -1)
    x = jax.nn.relu(x @ p["fc1"].T)
    x = jax.nn.relu(x @ p["fc2"].T)
    return x @ p["fc3"].T


# ---------------------------------- main ------------------------------------ #

if __name__ == "__main__":
    key = jax.random.PRNGKey(0)
    k_x, k_p = jax.random.split(key)

    inp_shape = [4, 16, 16]          # [C, H, W]
    batch = 2
    x = jax.random.normal(k_x, (batch, *inp_shape), jnp.float32)  # NCHW

    params = init_params(k_p, inp_shape)
    prep = prepare_params(params, inp_shape)   # one-time weight preprocessing

    out = cnn_small_forward(x, prep["m1"], prep["m2"],
                            prep["fc1"], prep["fc2"], prep["fc3"])
    out = jax.block_until_ready(out)

    ref = jax.block_until_ready(reference_forward(x, params))
    assert out.shape == (batch, 10)
    err = float(jnp.max(jnp.abs(out - ref)))
    assert jnp.allclose(out, ref, atol=1e-4, rtol=1e-4), f"max abs err {err}"

    print("KERNEL_OK")
</pallas_src>

<mosaic_0001>
module attributes {stable_mosaic.version = 11 : i64} {
  func.func @kernel(%arg0: i32, %arg1: memref<1x8x8x128xf32, #tpu.memory_space<vmem>>, %arg2: memref<2x5x128x120xf32, #tpu.memory_space<vmem>>, %arg3: memref<5x60x40xf32, #tpu.memory_space<vmem>>, %arg4: memref<20x128xf32, #tpu.memory_space<vmem>>, %arg5: memref<128x64xf32, #tpu.memory_space<vmem>>, %arg6: memref<64x10xf32, #tpu.memory_space<vmem>>, %arg7: memref<8x10xf32, #tpu.memory_space<vmem>>) attributes {dimension_semantics = [#tpu.dimension_semantics<parallel>], iteration_bounds = array<i64: 1>, scalar_prefetch = 0 : i64, scratch_operands = 0 : i64, tpu.core_type = #tpu.core_type<tc>, window_params = [{transform_indices = @transform_0, window_bounds = array<i64: 1, 8, 8, 128>}, {pipeline_mode = #tpu.pipeline_mode<synchronous>, transform_indices = @transform_1, window_bounds = array<i64: 2, 5, 128, 120>}, {pipeline_mode = #tpu.pipeline_mode<synchronous>, transform_indices = @transform_2, window_bounds = array<i64: 5, 60, 40>}, {pipeline_mode = #tpu.pipeline_mode<synchronous>, transform_indices = @transform_3, window_bounds = array<i64: 20, 128>}, {pipeline_mode = #tpu.pipeline_mode<synchronous>, transform_indices = @transform_4, window_bounds = array<i64: 128, 64>}, {pipeline_mode = #tpu.pipeline_mode<synchronous>, transform_indices = @transform_5, window_bounds = array<i64: 64, 10>}, {transform_indices = @transform_6, window_bounds = array<i64: 8, 10>}]} {
    %c0 = arith.constant 0 : index
    %c0_0 = arith.constant 0 : index
    %c0_1 = arith.constant 0 : index
    %c0_2 = arith.constant 0 : index
    %0 = vector.load %arg1[%c0, %c0_0, %c0_1, %c0_2] : memref<1x8x8x128xf32, #tpu.memory_space<vmem>>, vector<1x6x8x128xf32>
    %1 = vector.shape_cast %0 : vector<1x6x8x128xf32> to vector<6x8x128xf32>
    %2 = vector.shape_cast %1 : vector<6x8x128xf32> to vector<48x128xf32>
    %c0_3 = arith.constant 0 : index
    %c1 = arith.constant 1 : index
    %c0_4 = arith.constant 0 : index
    %c0_5 = arith.constant 0 : index
    %3 = vector.load %arg1[%c0_3, %c1, %c0_4, %c0_5] : memref<1x8x8x128xf32, #tpu.memory_space<vmem>>, vector<1x6x8x128xf32>
    %4 = vector.shape_cast %3 : vector<1x6x8x128xf32> to vector<6x8x128xf32>
    %5 = vector.shape_cast %4 : vector<6x8x128xf32> to vector<48x128xf32>
    %c0_6 = arith.constant 0 : index
    %c2 = arith.constant 2 : index
    %c0_7 = arith.constant 0 : index
    %c0_8 = arith.constant 0 : index
    %6 = vector.load %arg1[%c0_6, %c2, %c0_7, %c0_8] : memref<1x8x8x128xf32, #tpu.memory_space<vmem>>, vector<1x6x8x128xf32>
    %7 = vector.shape_cast %6 : vector<1x6x8x128xf32> to vector<6x8x128xf32>
    %8 = vector.shape_cast %7 : vector<6x8x128xf32> to vector<48x128xf32>
    %cst = arith.constant 0.000000e+00 : f32
    %9 = vector.broadcast %cst : f32 to vector<48x120xf32>
    %c0_9 = arith.constant 0 : index
    %c0_10 = arith.constant 0 : index
    %c0_11 = arith.constant 0 : index
    %c0_12 = arith.constant 0 : index
    %10 = vector.load %arg2[%c0_9, %c0_10, %c0_11, %c0_12] : memref<2x5x128x120xf32, #tpu.memory_space<vmem>>, vector<1x1x128x120xf32>
    %11 = vector.shape_cast %10 : vector<1x1x128x120xf32> to vector<128x120xf32>
    %cst_13 = arith.constant dense<0.000000e+00> : vector<48x120xf32>
    %12 = tpu.matmul %2, %11, %cst_13 {dimension_numbers = #tpu.dot_dimension_numbers<[1], [0], [0], [1], [0, 0, 1, 1], [], []>} : vector<48x128xf32>, vector<128x120xf32>, vector<48x120xf32> -> vector<48x120xf32>
    %13 = arith.addf %9, %12 : vector<48x120xf32>
    %c0_14 = arith.constant 0 : index
    %c1_15 = arith.constant 1 : index
    %c0_16 = arith.constant 0 : index
    %c0_17 = arith.constant 0 : index
    %14 = vector.load %arg2[%c0_14, %c1_15, %c0_16, %c0_17] : memref<2x5x128x120xf32, #tpu.memory_space<vmem>>, vector<1x1x128x120xf32>
    %15 = vector.shape_cast %14 : vector<1x1x128x120xf32> to vector<128x120xf32>
    %cst_18 = arith.constant dense<0.000000e+00> : vector<48x120xf32>
    %16 = tpu.matmul %2, %15, %cst_18 {dimension_numbers = #tpu.dot_dimension_numbers<[1], [0], [0], [1], [0, 0, 1, 1], [], []>} : vector<48x128xf32>, vector<128x120xf32>, vector<48x120xf32> -> vector<48x120xf32>
    %17 = arith.addf %13, %16 : vector<48x120xf32>
    %c0_19 = arith.constant 0 : index
    %c2_20 = arith.constant 2 : index
    %c0_21 = arith.constant 0 : index
    %c0_22 = arith.constant 0 : index
    %18 = vector.load %arg2[%c0_19, %c2_20, %c0_21, %c0_22] : memref<2x5x128x120xf32, #tpu.memory_space<vmem>>, vector<1x1x128x120xf32>
    %19 = vector.shape_cast %18 : vector<1x1x128x120xf32> to vector<128x120xf32>
    %cst_23 = arith.constant dense<0.000000e+00> : vector<48x120xf32>
    %20 = tpu.matmul %5, %19, %cst_23 {dimension_numbers = #tpu.dot_dimension_numbers<[1], [0], [0], [1], [0, 0, 1, 1], [], []>} : vector<48x128xf32>, vector<128x120xf32>, vector<48x120xf32> -> vector<48x120xf32>
    %21 = arith.addf %17, %20 : vector<48x120xf32>
    %c0_24 = arith.constant 0 : index
    %c3 = arith.constant 3 : index
    %c0_25 = arith.constant 0 : index
    %c0_26 = arith.constant 0 : index
    %22 = vector.load %arg2[%c0_24, %c3, %c0_25, %c0_26] : memref<2x5x128x120xf32, #tpu.memory_space<vmem>>, vector<1x1x128x120xf32>
    %23 = vector.shape_cast %22 : vector<1x1x128x120xf32> to vector<128x120xf32>
    %cst_27 = arith.constant dense<0.000000e+00> : vector<48x120xf32>
    %24 = tpu.matmul %5, %23, %cst_27 {dimension_numbers = #tpu.dot_dimension_numbers<[1], [0], [0], [1], [0, 0, 1, 1], [], []>} : vector<48x128xf32>, vector<128x120xf32>, vector<48x120xf32> -> vector<48x120xf32>
    %25 = arith.addf %21, %24 : vector<48x120xf32>
    %c0_28 = arith.constant 0 : index
    %c4 = arith.constant 4 : index
    %c0_29 = arith.constant 0 : index
    %c0_30 = arith.constant 0 : index
    %26 = vector.load %arg2[%c0_28, %c4, %c0_29, %c0_30] : memref<2x5x128x120xf32, #tpu.memory_space<vmem>>, vector<1x1x128x120xf32>
    %27 = vector.shape_cast %26 : vector<1x1x128x120xf32> to vector<128x120xf32>
    %cst_31 = arith.constant dense<0.000000e+00> : vector<48x120xf32>
    %28 = tpu.matmul %8, %27, %cst_31 {dimension_numbers = #tpu.dot_dimension_numbers<[1], [0], [0], [1], [0, 0, 1, 1], [], []>} : vector<48x128xf32>, vector<128x120xf32>, vector<48x120xf32> -> vector<48x120xf32>
    %29 = arith.addf %25, %28 : vector<48x120xf32>
    %30 = vector.extract_strided_slice %29 {offsets = [0, 0], sizes = [48, 60], strides = [1, 1]} : vector<48x120xf32> to vector<48x60xf32>
    %31 = vector.extract_strided_slice %29 {offsets = [0, 60], sizes = [48, 60], strides = [1, 1]} : vector<48x120xf32> to vector<48x60xf32>
    %32 = arith.maximumf %30, %31 : vector<48x60xf32>
    %cst_32 = arith.constant 0.000000e+00 : f32
    %33 = vector.broadcast %cst_32 : f32 to vector<48x120xf32>
    %c1_33 = arith.constant 1 : index
    %c0_34 = arith.constant 0 : index
    %c0_35 = arith.constant 0 : index
    %c0_36 = arith.constant 0 : index
    %34 = vector.load %arg2[%c1_33, %c0_34, %c0_35, %c0_36] : memref<2x5x128x120xf32, #tpu.memory_space<vmem>>, vector<1x1x128x120xf32>
    %35 = vector.shape_cast %34 : vector<1x1x128x120xf32> to vector<128x120xf32>
    %cst_37 = arith.constant dense<0.000000e+00> : vector<48x120xf32>
    %36 = tpu.matmul %2, %35, %cst_37 {dimension_numbers = #tpu.dot_dimension_numbers<[1], [0], [0], [1], [0, 0, 1, 1], [], []>} : vector<48x128xf32>, vector<128x120xf32>, vector<48x120xf32> -> vector<48x120xf32>
    %37 = arith.addf %33, %36 : vector<48x120xf32>
    %c1_38 = arith.constant 1 : index
    %c1_39 = arith.constant 1 : index
    %c0_40 = arith.constant 0 : index
    %c0_41 = arith.constant 0 : index
    %38 = vector.load %arg2[%c1_38, %c1_39, %c0_40, %c0_41] : memref<2x5x128x120xf32, #tpu.memory_space<vmem>>, vector<1x1x128x120xf32>
    %39 = vector.shape_cast %38 : vector<1x1x128x120xf32> to vector<128x120xf32>
    %cst_42 = arith.constant dense<0.000000e+00> : vector<48x120xf32>
    %40 = tpu.matmul %5, %39, %cst_42 {dimension_numbers = #tpu.dot_dimension_numbers<[1], [0], [0], [1], [0, 0, 1, 1], [], []>} : vector<48x128xf32>, vector<128x120xf32>, vector<48x120xf32> -> vector<48x120xf32>
    %41 = arith.addf %37, %40 : vector<48x120xf32>
    %c1_43 = arith.constant 1 : index
    %c2_44 = arith.constant 2 : index
    %c0_45 = arith.constant 0 : index
    %c0_46 = arith.constant 0 : index
    %42 = vector.load %arg2[%c1_43, %c2_44, %c0_45, %c0_46] : memref<2x5x128x120xf32, #tpu.memory_space<vmem>>, vector<1x1x128x120xf32>
    %43 = vector.shape_cast %42 : vector<1x1x128x120xf32> to vector<128x120xf32>
    %cst_47 = arith.constant dense<0.000000e+00> : vector<48x120xf32>
    %44 = tpu.matmul %5, %43, %cst_47 {dimension_numbers = #tpu.dot_dimension_numbers<[1], [0], [0], [1], [0, 0, 1, 1], [], []>} : vector<48x128xf32>, vector<128x120xf32>, vector<48x120xf32> -> vector<48x120xf32>
    %45 = arith.addf %41, %44 : vector<48x120xf32>
    %c1_48 = arith.constant 1 : index
    %c3_49 = arith.constant 3 : index
    %c0_50 = arith.constant 0 : index
    %c0_51 = arith.constant 0 : index
    %46 = vector.load %arg2[%c1_48, %c3_49, %c0_50, %c0_51] : memref<2x5x128x120xf32, #tpu.memory_space<vmem>>, vector<1x1x128x120xf32>
    %47 = vector.shape_cast %46 : vector<1x1x128x120xf32> to vector<128x120xf32>
    %cst_52 = arith.constant dense<0.000000e+00> : vector<48x120xf32>
    %48 = tpu.matmul %8, %47, %cst_52 {dimension_numbers = #tpu.dot_dimension_numbers<[1], [0], [0], [1], [0, 0, 1, 1], [], []>} : vector<48x128xf32>, vector<128x120xf32>, vector<48x120xf32> -> vector<48x120xf32>
    %49 = arith.addf %45, %48 : vector<48x120xf32>
    %c1_53 = arith.constant 1 : index
    %c4_54 = arith.constant 4 : index
    %c0_55 = arith.constant 0 : index
    %c0_56 = arith.constant 0 : index
    %50 = vector.load %arg2[%c1_53, %c4_54, %c0_55, %c0_56] : memref<2x5x128x120xf32, #tpu.memory_space<vmem>>, vector<1x1x128x120xf32>
    %51 = vector.shape_cast %50 : vector<1x1x128x120xf32> to vector<128x120xf32>
    %cst_57 = arith.constant dense<0.000000e+00> : vector<48x120xf32>
    %52 = tpu.matmul %8, %51, %cst_57 {dimension_numbers = #tpu.dot_dimension_numbers<[1], [0], [0], [1], [0, 0, 1, 1], [], []>} : vector<48x128xf32>, vector<128x120xf32>, vector<48x120xf32> -> vector<48x120xf32>
    %53 = arith.addf %49, %52 : vector<48x120xf32>
    %54 = vector.extract_strided_slice %53 {offsets = [0, 0], sizes = [48, 60], strides = [1, 1]} : vector<48x120xf32> to vector<48x60xf32>
    %55 = vector.extract_strided_slice %53 {offsets = [0, 60], sizes = [48, 60], strides = [1, 1]} : vector<48x120xf32> to vector<48x60xf32>
    %56 = arith.maximumf %54, %55 : vector<48x60xf32>
    %57 = arith.maximumf %32, %56 : vector<48x60xf32>
    %cst_58 = arith.constant 0.000000e+00 : f32
    %58 = vector.broadcast %cst_58 : f32 to vector<48x60xf32>
    %59 = arith.maximumf %57, %58 : vector<48x60xf32>
    %cst_59 = arith.constant 0.000000e+00 : f32
    %60 = vector.broadcast %cst_59 : f32 to vector<16x40xf32>
    %61 = vector.extract_strided_slice %59 {offsets = [0, 0], sizes = [16, 60], strides = [1, 1]} : vector<48x60xf32> to vector<16x60xf32>
    %c0_60 = arith.constant 0 : index
    %c0_61 = arith.constant 0 : index
    %c0_62 = arith.constant 0 : index
    %62 = vector.load %arg3[%c0_60, %c0_61, %c0_62] : memref<5x60x40xf32, #tpu.memory_space<vmem>>, vector<1x60x40xf32>
    %63 = vector.shape_cast %62 : vector<1x60x40xf32> to vector<60x40xf32>
    %cst_63 = arith.constant dense<0.000000e+00> : vector<16x40xf32>
    %64 = tpu.matmul %61, %63, %cst_63 {dimension_numbers = #tpu.dot_dimension_numbers<[1], [0], [0], [1], [0, 0, 1, 1], [], []>} : vector<16x60xf32>, vector<60x40xf32>, vector<16x40xf32> -> vector<16x40xf32>
    %65 = arith.addf %60, %64 : vector<16x40xf32>
    %66 = vector.extract_strided_slice %59 {offsets = [8, 0], sizes = [16, 60], strides = [1, 1]} : vector<48x60xf32> to vector<16x60xf32>
    %c1_64 = arith.constant 1 : index
    %c0_65 = arith.constant 0 : index
    %c0_66 = arith.constant 0 : index
    %67 = vector.load %arg3[%c1_64, %c0_65, %c0_66] : memref<5x60x40xf32, #tpu.memory_space<vmem>>, vector<1x60x40xf32>
    %68 = vector.shape_cast %67 : vector<1x60x40xf32> to vector<60x40xf32>
    %cst_67 = arith.constant dense<0.000000e+00> : vector<16x40xf32>
    %69 = tpu.matmul %66, %68, %cst_67 {dimension_numbers = #tpu.dot_dimension_numbers<[1], [0], [0], [1], [0, 0, 1, 1], [], []>} : vector<16x60xf32>, vector<60x40xf32>, vector<16x40xf32> -> vector<16x40xf32>
    %70 = arith.addf %65, %69 : vector<16x40xf32>
    %71 = vector.extract_strided_slice %59 {offsets = [16, 0], sizes = [16, 60], strides = [1, 1]} : vector<48x60xf32> to vector<16x60xf32>
    %c2_68 = arith.constant 2 : index
    %c0_69 = arith.constant 0 : index
    %c0_70 = arith.constant 0 : index
    %72 = vector.load %arg3[%c2_68, %c0_69, %c0_70] : memref<5x60x40xf32, #tpu.memory_space<vmem>>, vector<1x60x40xf32>
    %73 = vector.shape_cast %72 : vector<1x60x40xf32> to vector<60x40xf32>
    %cst_71 = arith.constant dense<0.000000e+00> : vector<16x40xf32>
    %74 = tpu.matmul %71, %73, %cst_71 {dimension_numbers = #tpu.dot_dimension_numbers<[1], [0], [0], [1], [0, 0, 1, 1], [], []>} : vector<16x60xf32>, vector<60x40xf32>, vector<16x40xf32> -> vector<16x40xf32>
    %75 = arith.addf %70, %74 : vector<16x40xf32>
    %76 = vector.extract_strided_slice %59 {offsets = [24, 0], sizes = [16, 60], strides = [1, 1]} : vector<48x60xf32> to vector<16x60xf32>
    %c3_72 = arith.constant 3 : index
    %c0_73 = arith.constant 0 : index
    %c0_74 = arith.constant 0 : index
    %77 = vector.load %arg3[%c3_72, %c0_73, %c0_74] : memref<5x60x40xf32, #tpu.memory_space<vmem>>, vector<1x60x40xf32>
    %78 = vector.shape_cast %77 : vector<1x60x40xf32> to vector<60x40xf32>
    %cst_75 = arith.constant dense<0.000000e+00> : vector<16x40xf32>
    %79 = tpu.matmul %76, %78, %cst_75 {dimension_numbers = #tpu.dot_dimension_numbers<[1], [0], [0], [1], [0, 0, 1, 1], [], []>} : vector<16x60xf32>, vector<60x40xf32>, vector<16x40xf32> -> vector<16x40xf32>
    %80 = arith.addf %75, %79 : vector<16x40xf32>
    %81 = vector.extract_strided_slice %59 {offsets = [32, 0], sizes = [16, 60], strides = [1, 1]} : vector<48x60xf32> to vector<16x60xf32>
    %c4_76 = arith.constant 4 : index
    %c0_77 = arith.constant 0 : index
    %c0_78 = arith.constant 0 : index
    %82 = vector.load %arg3[%c4_76, %c0_77, %c0_78] : memref<5x60x40xf32, #tpu.memory_space<vmem>>, vector<1x60x40xf32>
    %83 = vector.shape_cast %82 : vector<1x60x40xf32> to vector<60x40xf32>
    %cst_79 = arith.constant dense<0.000000e+00> : vector<16x40xf32>
    %84 = tpu.matmul %81, %83, %cst_79 {dimension_numbers = #tpu.dot_dimension_numbers<[1], [0], [0], [1], [0, 0, 1, 1], [], []>} : vector<16x60xf32>, vector<60x40xf32>, vector<16x40xf32> -> vector<16x40xf32>
    %85 = arith.addf %80, %84 : vector<16x40xf32>
    %86 = vector.extract_strided_slice %85 {offsets = [0, 0], sizes = [16, 20], strides = [1, 1]} : vector<16x40xf32> to vector<16x20xf32>
    %87 = vector.extract_strided_slice %85 {offsets = [0, 20], sizes = [16, 20], strides = [1, 1]} : vector<16x40xf32> to vector<16x20xf32>
    %88 = arith.maximumf %86, %87 : vector<16x20xf32>
    %89 = vector.extract_strided_slice %88 {offsets = [0, 0], sizes = [8, 20], strides = [1, 1]} : vector<16x20xf32> to vector<8x20xf32>
    %90 = vector.extract_strided_slice %88 {offsets = [8, 0], sizes = [8, 20], strides = [1, 1]} : vector<16x20xf32> to vector<8x20xf32>
    %91 = arith.maximumf %89, %90 : vector<8x20xf32>
    %cst_80 = arith.constant 0.000000e+00 : f32
    %92 = vector.broadcast %cst_80 : f32 to vector<8x20xf32>
    %93 = arith.maximumf %91, %92 : vector<8x20xf32>
    %c0_81 = arith.constant 0 : index
    %c0_82 = arith.constant 0 : index
    %94 = vector.load %arg4[%c0_81, %c0_82] : memref<20x128xf32, #tpu.memory_space<vmem>>, vector<20x128xf32>
    %cst_83 = arith.constant dense<0.000000e+00> : vector<8x128xf32>
    %95 = tpu.matmul %93, %94, %cst_83 {dimension_numbers = #tpu.dot_dimension_numbers<[1], [0], [0], [1], [0, 0, 1, 1], [], []>} : vector<8x20xf32>, vector<20x128xf32>, vector<8x128xf32> -> vector<8x128xf32>
    %cst_84 = arith.constant 0.000000e+00 : f32
    %96 = vector.broadcast %cst_84 : f32 to vector<8x128xf32>
    %97 = arith.maximumf %95, %96 : vector<8x128xf32>
    %c0_85 = arith.constant 0 : index
    %c0_86 = arith.constant 0 : index
    %98 = vector.load %arg5[%c0_85, %c0_86] : memref<128x64xf32, #tpu.memory_space<vmem>>, vector<128x64xf32>
    %cst_87 = arith.constant dense<0.000000e+00> : vector<8x64xf32>
    %99 = tpu.matmul %97, %98, %cst_87 {dimension_numbers = #tpu.dot_dimension_numbers<[1], [0], [0], [1], [0, 0, 1, 1], [], []>} : vector<8x128xf32>, vector<128x64xf32>, vector<8x64xf32> -> vector<8x64xf32>
    %cst_88 = arith.constant 0.000000e+00 : f32
    %100 = vector.broadcast %cst_88 : f32 to vector<8x64xf32>
    %101 = arith.maximumf %99, %100 : vector<8x64xf32>
    %c0_89 = arith.constant 0 : index
    %c0_90 = arith.constant 0 : index
    %102 = vector.load %arg6[%c0_89, %c0_90] : memref<64x10xf32, #tpu.memory_space<vmem>>, vector<64x10xf32>
    %cst_91 = arith.constant dense<0.000000e+00> : vector<8x10xf32>
    %103 = tpu.matmul %101, %102, %cst_91 {dimension_numbers = #tpu.dot_dimension_numbers<[1], [0], [0], [1], [0, 0, 1, 1], [], []>} : vector<8x64xf32>, vector<64x10xf32>, vector<8x10xf32> -> vector<8x10xf32>
    %c0_92 = arith.constant 0 : index
    %c0_93 = arith.constant 0 : index
    %104 = vector.load %arg7[%c0_92, %c0_93] : memref<8x10xf32, #tpu.memory_space<vmem>>, vector<8x10xf32>
    tpu.vector_store %arg7[%c0_92, %c0_93], %103 {strides = array<i32>} : memref<8x10xf32, #tpu.memory_space<vmem>>, vector<8x10xf32>,
    return
  }
  func.func @transform_0(%arg0: i32) -> (i32, i32, i32, i32) {
    %c0_i32 = arith.constant 0 : i32
    %c0_i32_0 = arith.constant 0 : i32
    %c0_i32_1 = arith.constant 0 : i32
    %c0_i32_2 = arith.constant 0 : i32
    return %arg0, %c0_i32, %c0_i32_0, %c0_i32_1 : i32, i32, i32, i32
  }
  func.func @transform_1(%arg0: i32) -> (i32, i32, i32, i32) {
    %c0_i32 = arith.constant 0 : i32
    %c0_i32_0 = arith.constant 0 : i32
    %c0_i32_1 = arith.constant 0 : i32
    %c0_i32_2 = arith.constant 0 : i32
    %c0_i32_3 = arith.constant 0 : i32
    return %c0_i32, %c0_i32_0, %c0_i32_1, %c0_i32_2 : i32, i32, i32, i32
  }
  func.func @transform_2(%arg0: i32) -> (i32, i32, i32) {
    %c0_i32 = arith.constant 0 : i32
    %c0_i32_0 = arith.constant 0 : i32
    %c0_i32_1 = arith.constant 0 : i32
    %c0_i32_2 = arith.constant 0 : i32
    return %c0_i32, %c0_i32_0, %c0_i32_1 : i32, i32, i32
  }
  func.func @transform_3(%arg0: i32) -> (i32, i32) {
    %c0_i32 = arith.constant 0 : i32
    %c0_i32_0 = arith.constant 0 : i32
    %c0_i32_1 = arith.constant 0 : i32
    return %c0_i32, %c0_i32_0 : i32, i32
  }
  func.func @transform_4(%arg0: i32) -> (i32, i32) {
    %c0_i32 = arith.constant 0 : i32
    %c0_i32_0 = arith.constant 0 : i32
    %c0_i32_1 = arith.constant 0 : i32
    return %c0_i32, %c0_i32_0 : i32, i32
  }
  func.func @transform_5(%arg0: i32) -> (i32, i32) {
    %c0_i32 = arith.constant 0 : i32
    %c0_i32_0 = arith.constant 0 : i32
    %c0_i32_1 = arith.constant 0 : i32
    return %c0_i32, %c0_i32_0 : i32, i32
  }
  func.func @transform_6(%arg0: i32) -> (i32, i32) {
    %c0_i32 = arith.constant 0 : i32
    %c0_i32_0 = arith.constant 0 : i32
    return %arg0, %c0_i32 : i32, i32
  }
}

</mosaic_0001>

<bundles_post_ra>
// kernel: cnn_small_forward.1
= control target key start
LH: loop header
LB: loop body
LE: loop exit
PB: predicated region body
PF: predicated region fallthrough
CT: control target
= control target key end

     0   :  { %vm1294_vm0 = vcmask 1043456   ;;  %vm3583_vm1 = vmmov 1   ;;  %s3584_s28 = smov 68   ;;  %vm1287_vm3 = vcmask 490496   ;;  %vm3587_vm4 = vmmov 0   ;;  %s3588_s26 = smov 108   ;;  %s4472_s1 = inlined_call_operand.vmem [shape: f32[2,5,128,120], index: 1, kind: input, shape index: {}]   ;;  %s4473_s0 = inlined_call_operand.vmem [shape: f32[1,8,8,128], index: 0, kind: input, shape index: {}]   ;;  %s4474_s2 = inlined_call_operand.vmem [shape: f32[5,60,40], index: 2, kind: input, shape index: {}]   ;;  %s4475_s3 = inlined_call_operand.vmem [shape: f32[20,128], index: 3, kind: input, shape index: {}]   ;;  %s4476_s4 = inlined_call_operand.vmem [shape: f32[128,64], index: 4, kind: input, shape index: {}]   ;;  %s4477_s5 = inlined_call_operand.vmem [shape: f32[64,10], index: 5, kind: input, shape index: {}]   ;;  %s4478_s6 = inlined_call_operand.vmem [shape: f32[8,10], index: 6, kind: output, shape index: {}]  }
   0x1   :  { %v2010_v0 = vld [vmem:[%s4472_s1 + $0x80] sm:$0xff]  ;;  %v2011_v1 = vld [vmem:[%s4472_s1 + $0x88] sm:$0xff]  ;;  %v2012_v5 = vld [vmem:[%s4472_s1 + $0x90] sm:$0xff]  ;;  %vm1745_vm5 = vcmask 162816   ;;  %vm1918_vm6 = vcmask 523264   ;;  %vm1992_vm7 = vcmask 80896  }
   0x2   :  { %v2090_v2 = vld [vmem:[%s4472_s1 + $0x300] sm:$0xff]  ;;  %v3072_v3 = vpack.c.bf16 %v2011_v1, %v2010_v0  ;;  %v2091_v4 = vld [vmem:[%s4472_s1 + $0x308] sm:$0xff]  ;;  %v2013_v6 = vld [vmem:[%s4472_s1 + $0x98] sm:$0xff] }
   0x3   :  { %v3232_v7 = vpack.c.bf16 %v2091_v4, %v2090_v2  ;;  %v3076_v8 = vpack.c.bf16 %v2013_v6, %v2012_v5  ;;  %v2092_v9 = vld [vmem:[%s4472_s1 + $0x310] sm:$0xff]  ;;  %v2093_v10 = vld [vmem:[%s4472_s1 + $0x318] sm:$0xff]  ;;  %v2014_v11 = vld [vmem:[%s4472_s1 + $0xa0] sm:$0xff] }
   0x4   :  { %3073 = vmatprep.subr.bf16.mxu0 %v3072_v3  ;;  %v3236_v12 = vpack.c.bf16 %v2093_v10, %v2092_v9  ;;  %v2015_v13 = vld [vmem:[%s4472_s1 + $0xa8] sm:$0xff]  ;;  %v2094_v14 = vld [vmem:[%s4472_s1 + $0x320] sm:$0xff]  ;;  %v2016_v18 = vld [vmem:[%s4472_s1 + $0xb0] sm:$0xff] }
   0x5   :  { %v2095_v15 = vld [vmem:[%s4472_s1 + $0x328] sm:$0xff]  ;;  %3233 = vmatprep.subr.bf16.mxu1 %v3232_v7  ;;  %3075 = vmatpush3.bf16.msra.mxu0 %v3072_v3  ;;  %v3080_v16 = vpack.c.bf16 %v2015_v13, %v2014_v11  ;;  %v2017_v19 = vld [vmem:[%s4472_s1 + $0xb8] sm:$0xff]  ;;  %v2096_v20 = vld [vmem:[%s4472_s1 + $0x330] sm:$0xff] }
   0x6   :  { %3235 = vmatpush3.bf16.msra.mxu1 %v3232_v7  ;;  %3077 = vmatprep.subr.bf16.mxu0 %v3076_v8  ;;  %v3240_v17 = vpack.c.bf16 %v2095_v15, %v2094_v14  ;;  %v2097_v21 = vld [vmem:[%s4472_s1 + $0x338] sm:$0xff]  ;;  %v3084_v22 = vpack.c.bf16 %v2017_v19, %v2016_v18  ;;  %v2018_v24 = vld [vmem:[%s4472_s1 + $0xc0] sm:$0xff]  ;;  %v2019_v25 = vld [vmem:[%s4472_s1 + $0xc8] sm:$0xff] }
   0x7   :  { %3237 = vmatprep.subr.bf16.mxu1 %v3236_v12  ;;  %v3244_v23 = vpack.c.bf16 %v2097_v21, %v2096_v20  ;;  %v3681_v26 = vld [vmem:[%s4473_s0] sm:$0xff]  ;;  %v2099_v28 = vld [vmem:[%s4472_s1 + $0x348] sm:$0xff]  ;;  %v3088_v30 = vpack.c.bf16 %v2019_v25, %v2018_v24  ;;  %v2020_v32 = vld [vmem:[%s4472_s1 + $0xd0] sm:$0xff] }
   0x8   :  { %v2098_v27 = vld [vmem:[%s4472_s1 + $0x340] sm:$0xff]  ;;  %2536 = vmatprep.mubr.f32.mxu0 %v3681_v26  ;;  %v3693_v29 = vld [vmem:[%s4473_s0 + $0x8] sm:$0xff]  ;;  %v2021_v33 = vld [vmem:[%s4472_s1 + $0xd8] sm:$0xff] }
   0x9   :  { %3079 = vmatpush3.bf16.msra.mxu0 %v3076_v8  ;;  %2741 = vmatprep.mubr.f32.mxu1 %v3693_v29  ;;  %v3248_v31 = vpack.c.bf16 %v2099_v28, %v2098_v27  ;;  %v2100_v34 = vld [vmem:[%s4472_s1 + $0x350] sm:$0xff]  ;;  %v2101_v35 = vld [vmem:[%s4472_s1 + $0x358] sm:$0xff]  ;;  %v3092_v36 = vpack.c.bf16 %v2021_v33, %v2020_v32  ;;  %v2022_v38 = vld [vmem:[%s4472_s1 + $0xe0] sm:$0xff] }
   0xa   :  { %3239 = vmatpush3.bf16.msra.mxu1 %v3236_v12  ;;  %3081 = vmatprep.subr.bf16.mxu0 %v3080_v16  ;;  %v3252_v37 = vpack.c.bf16 %v2101_v35, %v2100_v34  ;;  %v2023_v39 = vld [vmem:[%s4472_s1 + $0xe8] sm:$0xff]  ;;  %v2102_v40 = vld [vmem:[%s4472_s1 + $0x360] sm:$0xff]  ;;  %v2024_v44 = vld [vmem:[%s4472_s1 + $0xf0] sm:$0xff] }
   0xb   :  { %3241 = vmatprep.subr.bf16.mxu1 %v3240_v17  ;;  %v2103_v41 = vld [vmem:[%s4472_s1 + $0x368] sm:$0xff]  ;;  %v3096_v42 = vpack.c.bf16 %v2023_v39, %v2022_v38  ;;  %v2025_v45 = vld [vmem:[%s4472_s1 + $0xf8] sm:$0xff]  ;;  %v2104_v46 = vld [vmem:[%s4472_s1 + $0x370] sm:$0xff] }
   0xc   :  { %v3256_v43 = vpack.c.bf16 %v2103_v41, %v2102_v40  ;;  %v2105_v47 = vld [vmem:[%s4472_s1 + $0x378] sm:$0xff]  ;;  %v3100_v48 = vpack.c.bf16 %v2025_v45, %v2024_v44  ;;  %v43_v50 = vld [vmem:[%s4472_s1] sm:$0xff]  ;;  %v44_v51 = vld [vmem:[%s4472_s1 + $0x8] sm:$0xff] }
   0xd   :  { %3083 = vmatpush3.bf16.msra.mxu0 %v3080_v16  ;;  %v3260_v49 = vpack.c.bf16 %v2105_v47, %v2104_v46  ;;  %v2074_v52 = vld [vmem:[%s4472_s1 + $0x280] sm:$0xff]  ;;  %v2075_v53 = vld [vmem:[%s4472_s1 + $0x288] sm:$0xff]  ;;  %v3104_v54 = vpack.c.bf16 %v44_v51, %v43_v50  ;;  %v45_v56 = vld [vmem:[%s4472_s1 + $0x10] sm:$0xff] }
   0xe   :  { %3243 = vmatpush3.bf16.msra.mxu1 %v3240_v17  ;;  %3085 = vmatprep.subr.bf16.mxu0 %v3084_v22  ;;  %v3264_v55 = vpack.c.bf16 %v2075_v53, %v2074_v52  ;;  %v46_v57 = vld [vmem:[%s4472_s1 + $0x18] sm:$0xff]  ;;  %v2076_v58 = vld [vmem:[%s4472_s1 + $0x290] sm:$0xff]  ;;  %v47_v63 = vld [vmem:[%s4472_s1 + $0x20] sm:$0xff] }
   0xf   :  { %3245 = vmatprep.subr.bf16.mxu1 %v3244_v23  ;;  %v2077_v59 = vld [vmem:[%s4472_s1 + $0x298] sm:$0xff]  ;;  %v3759_v60 = vld [vmem:[%s4473_s0 + $0x10] sm:$0xff]  ;;  %v3108_v61 = vpack.c.bf16 %v46_v57, %v45_v56  ;;  %v48_v0 = vld [vmem:[%s4472_s1 + $0x28] sm:$0xff] }
  0x10   :  { %v3268_v62 = vpack.c.bf16 %v2077_v59, %v2076_v58  ;;  %v2078_v1 = vld [vmem:[%s4472_s1 + $0x2a0] sm:$0xff]  ;;  %v2079_v2 = vld [vmem:[%s4472_s1 + $0x2a8] sm:$0xff]  ;;  %v3778_v3 = vld [vmem:[%s4473_s0 + $0x18] sm:$0xff]  ;;  %v3112_v4 = vpack.c.bf16 %v48_v0, %v47_v63 }
  0x11   :  { %3087 = vmatpush3.bf16.msra.mxu0 %v3084_v22  ;;  %v3783_v5 = vld [vmem:[%s4473_s0 + $0x20] sm:$0xff]  ;;  %v3272_v6 = vpack.c.bf16 %v2079_v2, %v2078_v1  ;;  %v49_v7 = vld [vmem:[%s4472_s1 + $0x30] sm:$0xff]  ;;  %v50_v8 = vld [vmem:[%s4472_s1 + $0x38] sm:$0xff] }
  0x12   :  { %3247 = vmatpush3.bf16.msra.mxu1 %v3244_v23  ;;  %3089 = vmatprep.subr.bf16.mxu0 %v3088_v30  ;;  %v2080_v9 = vld [vmem:[%s4472_s1 + $0x2b0] sm:$0xff]  ;;  %v2081_v10 = vld [vmem:[%s4472_s1 + $0x2b8] sm:$0xff]  ;;  %v3804_v11 = vld [vmem:[%s4473_s0 + $0x28] sm:$0xff]  ;;  %v3116_v12 = vpack.c.bf16 %v50_v8, %v49_v7 }
  0x13   :  { %3249 = vmatprep.subr.bf16.mxu1 %v3248_v31  ;;  %v3809_v13 = vld [vmem:[%s4473_s0 + $0x30] sm:$0xff]  ;;  %v3276_v14 = vpack.c.bf16 %v2081_v10, %v2080_v9  ;;  %v51_v15 = vld [vmem:[%s4472_s1 + $0x40] sm:$0xff]  ;;  %v52_v16 = vld [vmem:[%s4472_s1 + $0x48] sm:$0xff] }
  0x14   :  { %v2082_v17 = vld [vmem:[%s4472_s1 + $0x2c0] sm:$0xff]  ;;  %v2083_v18 = vld [vmem:[%s4472_s1 + $0x2c8] sm:$0xff]  ;;  %v3120_v19 = vpack.c.bf16 %v52_v16, %v51_v15  ;;  %v53_v21 = vld [vmem:[%s4472_s1 + $0x50] sm:$0xff] }
  0x15   :  { %3091 = vmatpush3.bf16.msra.mxu0 %v3088_v30  ;;  %v3280_v20 = vpack.c.bf16 %v2083_v18, %v2082_v17  ;;  %v54_v22 = vld [vmem:[%s4472_s1 + $0x58] sm:$0xff]  ;;  %v2084_v23 = vld [vmem:[%s4472_s1 + $0x2d0] sm:$0xff]  ;;  %v55_v28 = vld [vmem:[%s4472_s1 + $0x60] sm:$0xff] }
  0x16   :  { %3251 = vmatpush3.bf16.msra.mxu1 %v3248_v31  ;;  %3093 = vmatprep.subr.bf16.mxu0 %v3092_v36  ;;  %v2085_v24 = vld [vmem:[%s4472_s1 + $0x2d8] sm:$0xff]  ;;  %v3124_v25 = vpack.c.bf16 %v54_v22, %v53_v21  ;;  %v56_v30 = vld [vmem:[%s4472_s1 + $0x68] sm:$0xff]  ;;  %v2086_v31 = vld [vmem:[%s4472_s1 + $0x2e0] sm:$0xff] }
  0x17   :  { %3253 = vmatprep.subr.bf16.mxu1 %v3252_v37  ;;  %v3284_v27 = vpack.c.bf16 %v2085_v24, %v2084_v23  ;;  %v3128_v32 = vpack.c.bf16 %v56_v30, %v55_v28  ;;  %v57_v34 = vld [vmem:[%s4472_s1 + $0x70] sm:$0xff]  ;;  %v58_v35 = vld [vmem:[%s4472_s1 + $0x78] sm:$0xff]  ;;  %v2026_v40 = vld [vmem:[%s4472_s1 + $0x100] sm:$0xff] }
  0x18   :  { %v3132_v38 = vpack.c.bf16 %v58_v35, %v57_v34  ;;  %v2027_v41 = vld [vmem:[%s4472_s1 + $0x108] sm:$0xff]  ;;  %v2028_v46 = vld [vmem:[%s4472_s1 + $0x110] sm:$0xff]  ;;  %v2029_v47 = vld [vmem:[%s4472_s1 + $0x118] sm:$0xff] }
  0x19   :  { %3095 = vmatpush3.bf16.msra.mxu0 %v3092_v36  ;;  %v2088_v36 = vld [vmem:[%s4472_s1 + $0x2f0] sm:$0xff]  ;;  %v3136_v44 = vpack.c.bf16 %v2027_v41, %v2026_v40  ;;  %v3140_v50 = vpack.c.bf16 %v2029_v47, %v2028_v46  ;;  %v2030_v52 = vld [vmem:[%s4472_s1 + $0x120] sm:$0xff]  ;;  %v2031_v53 = vld [vmem:[%s4472_s1 + $0x128] sm:$0xff] }
  0x1a   :  { %3255 = vmatpush3.bf16.msra.mxu1 %v3252_v37  ;;  %3097 = vmatprep.subr.bf16.mxu0 %v3096_v42  ;;  %v2089_v37 = vld [vmem:[%s4472_s1 + $0x2f8] sm:$0xff]  ;;  %v3144_v56 = vpack.c.bf16 %v2031_v53, %v2030_v52  ;;  %v2032_v58 = vld [vmem:[%s4472_s1 + $0x130] sm:$0xff]  ;;  %v2034_v1 = vld [vmem:[%s4472_s1 + $0x140] sm:$0xff] }
  0x1b   :  { %3257 = vmatprep.subr.bf16.mxu1 %v3256_v43  ;;  %v3292_v39 = vpack.c.bf16 %v2089_v37, %v2088_v36  ;;  %v2033_v59 = vld [vmem:[%s4472_s1 + $0x138] sm:$0xff]  ;;  %v2035_v2 = vld [vmem:[%s4472_s1 + $0x148] sm:$0xff]  ;;  %v2036_v9 = vld [vmem:[%s4472_s1 + $0x150] sm:$0xff] }
  0x1c   :  { %v3148_v63 = vpack.c.bf16 %v2033_v59, %v2032_v58  ;;  %v3152_v7 = vpack.c.bf16 %v2035_v2, %v2034_v1  ;;  %v2037_v10 = vld [vmem:[%s4472_s1 + $0x158] sm:$0xff]  ;;  %v2038_v17 = vld [vmem:[%s4472_s1 + $0x160] sm:$0xff]  ;;  %v2039_v18 = vld [vmem:[%s4472_s1 + $0x168] sm:$0xff] }
  0x1d   :  { %3099 = vmatpush3.bf16.msra.mxu0 %v3096_v42  ;;  %v2106_v42 = vld [vmem:[%s4472_s1 + $0x380] sm:$0xff]  ;;  %v3156_v15 = vpack.c.bf16 %v2037_v10, %v2036_v9  ;;  %v3160_v21 = vpack.c.bf16 %v2039_v18, %v2038_v17  ;;  %v2040_v23 = vld [vmem:[%s4472_s1 + $0x170] sm:$0xff]  ;;  %v2041_v24 = vld [vmem:[%s4472_s1 + $0x178] sm:$0xff] }
  0x1e   :  { %3259 = vmatpush3.bf16.msra.mxu1 %v3256_v43  ;;  %3101 = vmatprep.subr.bf16.mxu0 %v3100_v48  ;;  %v2107_v43 = vld [vmem:[%s4472_s1 + $0x388] sm:$0xff]  ;;  %v3164_v28 = vpack.c.bf16 %v2041_v24, %v2040_v23  ;;  %v2044_v36 = vld [vmem:[%s4472_s1 + $0x190] sm:$0xff]  ;;  %v2045_v37 = vld [vmem:[%s4472_s1 + $0x198] sm:$0xff] }
  0x1f   :  { %3261 = vmatprep.subr.bf16.mxu1 %v3260_v49  ;;  %v3296_v45 = vpack.c.bf16 %v2107_v43, %v2106_v42  ;;  %v3172_v40 = vpack.c.bf16 %v2045_v37, %v2044_v36  ;;  %v2046_v42 = vld [vmem:[%s4472_s1 + $0x1a0] sm:$0xff]  ;;  %v2047_v43 = vld [vmem:[%s4472_s1 + $0x1a8] sm:$0xff]  ;;  %v2056_v10 = vld [vmem:[%s4472_s1 + $0x1f0] sm:$0xff] }
  0x20   :  { %v3176_v46 = vpack.c.bf16 %v2047_v43, %v2046_v42  ;;  %v2058_v18 = vld [vmem:[%s4472_s1 + $0x200] sm:$0xff]  ;;  %v2060_v24 = vld [vmem:[%s4472_s1 + $0x210] sm:$0xff]  ;;  %v4138_v42 = vld [vmem:[%s4473_s0 + $0x38] sm:$0xff] }
  0x21   :  { %3103 = vmatpush3.bf16.msra.mxu0 %v3100_v48  ;;  %v2108_v48 = vld [vmem:[%s4472_s1 + $0x390] sm:$0xff]  ;;  %vm4247_vm2 = vmpackc.low %vm1294_vm0, %vm3583_vm1 }
  0x22   :  { %3263 = vmatpush3.bf16.msra.mxu1 %v3260_v49  ;;  %3105 = vmatprep.subr.bf16.mxu0 %v3104_v54  ;;  %v2109_v49 = vld [vmem:[%s4472_s1 + $0x398] sm:$0xff]  ;;  %v2064_v37 = vld [vmem:[%s4472_s1 + $0x230] sm:$0xff] }
  0x23   :  { %3265 = vmatprep.subr.bf16.mxu1 %v3264_v55  ;;  %v3300_v51 = vpack.c.bf16 %v2109_v49, %v2108_v48  ;;  %v2048_v48 = vld [vmem:[%s4472_s1 + $0x1b0] sm:$0xff]  ;;  %v2049_v49 = vld [vmem:[%s4472_s1 + $0x1b8] sm:$0xff] }
  0x24   :  { %2537 = vmatmul.mubr.f32.vlgmr.msra.gmra.mrb[0].mxu0 %v3693_v29  ;;  %v3180_v52 = vpack.c.bf16 %v2049_v49, %v2048_v48 }
  0x25   :  { %3107 = vmatpush3.bf16.msra.mxu0 %v3104_v54  ;;  %2742 = vmatmul.mubr.f32.vlgmr.msra.gmra.mrb[0].mxu1 %v3759_v60  ;;  %v2110_v54 = vld [vmem:[%s4472_s1 + $0x3a0] sm:$0xff] }
  0x26   :  { %3267 = vmatpush3.bf16.msra.mxu1 %v3264_v55  ;;  %3109 = vmatprep.subr.bf16.mxu0 %v3108_v61  ;;  %v2111_v55 = vld [vmem:[%s4472_s1 + $0x3a8] sm:$0xff] }
  0x27   :  { %3269 = vmatprep.subr.bf16.mxu1 %v3268_v62  ;;  %2539 = vmatprep.mubr.f32.mxu0 %v3759_v60  ;;  %v3304_v57 = vpack.c.bf16 %v2111_v55, %v2110_v54  ;;  %v2050_v54 = vld [vmem:[%s4472_s1 + $0x1c0] sm:$0xff]  ;;  %v2051_v55 = vld [vmem:[%s4472_s1 + $0x1c8] sm:$0xff] }
  0x28   :  { %2744 = vmatprep.mubr.f32.mxu1 %v3778_v3  ;;  %2540 = vmatmul.mubr.f32.gmra.mrb[2].mxu0 %v3778_v3  ;;  %v3184_v58 = vpack.c.bf16 %v2051_v55, %v2050_v54 }
  0x29   :  { %3111 = vmatpush3.bf16.msra.mxu0 %v3108_v61  ;;  %2745 = vmatmul.mubr.f32.gmra.mrb[2].mxu1 %v3783_v5  ;;  %v2112_v61 = vld [vmem:[%s4472_s1 + $0x3b0] sm:$0xff] }
  0x2a   :  { %3271 = vmatpush3.bf16.msra.mxu1 %v3268_v62  ;;  %3113 = vmatprep.subr.bf16.mxu0 %v3112_v4  ;;  %v2113_v62 = vld [vmem:[%s4472_s1 + $0x3b8] sm:$0xff] }
  0x2b   :  { %3273 = vmatprep.subr.bf16.mxu1 %v3272_v6  ;;  %2542 = vmatprep.mubr.f32.mxu0 %v3783_v5  ;;  %v3308_v0 = vpack.c.bf16 %v2113_v62, %v2112_v61  ;;  %v2052_v61 = vld [vmem:[%s4472_s1 + $0x1d0] sm:$0xff]  ;;  %v2053_v62 = vld [vmem:[%s4472_s1 + $0x1d8] sm:$0xff] }
  0x2c   :  { %2747 = vmatprep.mubr.f32.mxu1 %v3804_v11  ;;  %2543 = vmatmul.mubr.f32.gmra.mrb[4].mxu0 %v3804_v11  ;;  %v3188_v1 = vpack.c.bf16 %v2053_v62, %v2052_v61  ;;  %v2072_v62 = vld [vmem:[%s4472_s1 + $0x270] sm:$0xff] }
  0x2d   :  { %3115 = vmatpush3.bf16.msra.mxu0 %v3112_v4  ;;  %2748 = vmatmul.mubr.f32.gmra.mrb[4].mxu1 %v3809_v13  ;;  %v2114_v4 = vld [vmem:[%s4472_s1 + $0x3c0] sm:$0xff] }
  0x2e   :  { %3275 = vmatpush3.bf16.msra.mxu1 %v3272_v6  ;;  %3117 = vmatprep.subr.bf16.mxu0 %v3116_v12  ;;  %v2115_v6 = vld [vmem:[%s4472_s1 + $0x3c8] sm:$0xff] }
  0x2f   :  { %3277 = vmatprep.subr.bf16.mxu1 %v3276_v14  ;;  %2577 = vmatprep.mubr.f32.mxu0 %v3681_v26  ;;  %v3312_v8 = vpack.c.bf16 %v2115_v6, %v2114_v4  ;;  %v2055_v4 = vld [vmem:[%s4472_s1 + $0x1e8] sm:$0xff]  ;;  %v2134_v6 = vld [vmem:[%s4472_s1 + $0x460] sm:$0xff] }
  0x30   :  { %2782 = vmatprep.mubr.f32.mxu1 %v3681_v26  ;;  %v2087_v26 = vld [vmem:[%s4472_s1 + $0x2e8] sm:$0xff] }
  0x31   :  { %3119 = vmatpush3.bf16.msra.mxu0 %v3116_v12  ;;  %v3288_v33 = vpack.c.bf16 %v2087_v26, %v2086_v31  ;;  %v2116_v12 = vld [vmem:[%s4472_s1 + $0x3d0] sm:$0xff]  ;;  %v2042_v31 = vld [vmem:[%s4472_s1 + $0x180] sm:$0xff]  ;;  %v2043_v26 = vld [vmem:[%s4472_s1 + $0x188] sm:$0xff] }
  0x32   :  { %3279 = vmatpush3.bf16.msra.mxu1 %v3276_v14  ;;  %3121 = vmatprep.subr.bf16.mxu0 %v3120_v19  ;;  %v2117_v14 = vld [vmem:[%s4472_s1 + $0x3d8] sm:$0xff]  ;;  %v3168_v34 = vpack.c.bf16 %v2043_v26, %v2042_v31  ;;  %v2062_v26 = vld [vmem:[%s4472_s1 + $0x220] sm:$0xff] }
  0x33   :  { %3281 = vmatprep.subr.bf16.mxu1 %v3280_v20  ;;  %v3316_v16 = vpack.c.bf16 %v2117_v14, %v2116_v12  ;;  %v2057_v12 = vld [vmem:[%s4472_s1 + $0x1f8] sm:$0xff]  ;;  %v2136_v14 = vld [vmem:[%s4472_s1 + $0x470] sm:$0xff] }
  0x35   :  { %3123 = vmatpush3.bf16.msra.mxu0 %v3120_v19  ;;  %v2118_v19 = vld [vmem:[%s4472_s1 + $0x3e0] sm:$0xff] }
  0x36   :  { %3283 = vmatpush3.bf16.msra.mxu1 %v3280_v20  ;;  %3125 = vmatprep.subr.bf16.mxu0 %v3124_v25  ;;  %v2119_v20 = vld [vmem:[%s4472_s1 + $0x3e8] sm:$0xff] }
  0x37   :  { %3285 = vmatprep.subr.bf16.mxu1 %v3284_v27  ;;  %v3320_v22 = vpack.c.bf16 %v2119_v20, %v2118_v19  ;;  %v2059_v19 = vld [vmem:[%s4472_s1 + $0x208] sm:$0xff]  ;;  %v2138_v20 = vld [vmem:[%s4472_s1 + $0x480] sm:$0xff] }
  0x39   :  { %3127 = vmatpush3.bf16.msra.mxu0 %v3124_v25  ;;  %v2120_v25 = vld [vmem:[%s4472_s1 + $0x3f0] sm:$0xff] }
  0x3a   :  { %3287 = vmatpush3.bf16.msra.mxu1 %v3284_v27  ;;  %3129 = vmatprep.subr.bf16.mxu0 %v3128_v32  ;;  %v2121_v27 = vld [vmem:[%s4472_s1 + $0x3f8] sm:$0xff] }
  0x3b   :  { %3289 = vmatprep.subr.bf16.mxu1 %v3288_v33  ;;  %v3324_v30 = vpack.c.bf16 %v2121_v27, %v2120_v25  ;;  %v2061_v25 = vld [vmem:[%s4472_s1 + $0x218] sm:$0xff]  ;;  %v2140_v27 = vld [vmem:[%s4472_s1 + $0x490] sm:$0xff] }
  0x3d   :  { %3131 = vmatpush3.bf16.msra.mxu0 %v3128_v32  ;;  %v2122_v32 = vld [vmem:[%s4472_s1 + $0x400] sm:$0xff] }
  0x3e   :  { %3291 = vmatpush3.bf16.msra.mxu1 %v3288_v33  ;;  %3133 = vmatprep.subr.bf16.mxu0 %v3132_v38  ;;  %v2123_v33 = vld [vmem:[%s4472_s1 + $0x408] sm:$0xff] }
  0x3f   :  { %3293 = vmatprep.subr.bf16.mxu1 %v3292_v39  ;;  %v3328_v35 = vpack.c.bf16 %v2123_v33, %v2122_v32  ;;  %v2063_v32 = vld [vmem:[%s4472_s1 + $0x228] sm:$0xff]  ;;  %v2142_v33 = vld [vmem:[%s4472_s1 + $0x4a0] sm:$0xff] }
  0x41   :  { %3135 = vmatpush3.bf16.msra.mxu0 %v3132_v38  ;;  %v2124_v38 = vld [vmem:[%s4472_s1 + $0x410] sm:$0xff] }
  0x42   :  { %3295 = vmatpush3.bf16.msra.mxu1 %v3292_v39  ;;  %3137 = vmatprep.subr.bf16.mxu0 %v3136_v44  ;;  %v2125_v39 = vld [vmem:[%s4472_s1 + $0x418] sm:$0xff] }
  0x43   :  { %3297 = vmatprep.subr.bf16.mxu1 %v3296_v45  ;;  %v3332_v41 = vpack.c.bf16 %v2125_v39, %v2124_v38  ;;  %v2065_v38 = vld [vmem:[%s4472_s1 + $0x238] sm:$0xff]  ;;  %v2144_v39 = vld [vmem:[%s4472_s1 + $0x4b0] sm:$0xff] }
  0x44   :  { %2578 = vmatmul.mubr.f32.vlgmr.msra.gmra.mrb[0].mxu0 %v3693_v29 }
  0x45   :  { %3139 = vmatpush3.bf16.msra.mxu0 %v3136_v44  ;;  %2783 = vmatmul.mubr.f32.vlgmr.msra.gmra.mrb[0].mxu1 %v3693_v29  ;;  %v2126_v44 = vld [vmem:[%s4472_s1 + $0x420] sm:$0xff] }
  0x46   :  { %3299 = vmatpush3.bf16.msra.mxu1 %v3296_v45  ;;  %3141 = vmatprep.subr.bf16.mxu0 %v3140_v50  ;;  %v2127_v45 = vld [vmem:[%s4472_s1 + $0x428] sm:$0xff] }
  0x47   :  { %3301 = vmatprep.subr.bf16.mxu1 %v3300_v51  ;;  %2580 = vmatprep.mubr.f32.mxu0 %v3759_v60  ;;  %v3336_v47 = vpack.c.bf16 %v2127_v45, %v2126_v44  ;;  %v2066_v44 = vld [vmem:[%s4472_s1 + $0x240] sm:$0xff]  ;;  %v2067_v45 = vld [vmem:[%s4472_s1 + $0x248] sm:$0xff] }
  0x48   :  { %2785 = vmatprep.mubr.f32.mxu1 %v3759_v60  ;;  %2581 = vmatmul.mubr.f32.gmra.mrb[2].mxu0 %v3778_v3  ;;  %v3216_v48 = vpack.c.bf16 %v2067_v45, %v2066_v44 }
  0x49   :  { %3143 = vmatpush3.bf16.msra.mxu0 %v3140_v50  ;;  %2786 = vmatmul.mubr.f32.gmra.mrb[2].mxu1 %v3778_v3  ;;  %v2128_v50 = vld [vmem:[%s4472_s1 + $0x430] sm:$0xff] }
  0x4a   :  { %3303 = vmatpush3.bf16.msra.mxu1 %v3300_v51  ;;  %3145 = vmatprep.subr.bf16.mxu0 %v3144_v56  ;;  %v2129_v51 = vld [vmem:[%s4472_s1 + $0x438] sm:$0xff] }
  0x4b   :  { %3305 = vmatprep.subr.bf16.mxu1 %v3304_v57  ;;  %2583 = vmatprep.mubr.f32.mxu0 %v3783_v5  ;;  %v3340_v53 = vpack.c.bf16 %v2129_v51, %v2128_v50  ;;  %v2068_v50 = vld [vmem:[%s4472_s1 + $0x250] sm:$0xff]  ;;  %v2069_v51 = vld [vmem:[%s4472_s1 + $0x258] sm:$0xff] }
  0x4c   :  { %2788 = vmatprep.mubr.f32.mxu1 %v3783_v5  ;;  %2584 = vmatmul.mubr.f32.gmra.mrb[4].mxu0 %v3804_v11  ;;  %v3220_v54 = vpack.c.bf16 %v2069_v51, %v2068_v50 }
  0x4d   :  { %3147 = vmatpush3.bf16.msra.mxu0 %v3144_v56  ;;  %2789 = vmatmul.mubr.f32.gmra.mrb[4].mxu1 %v3804_v11  ;;  %v2130_v56 = vld [vmem:[%s4472_s1 + $0x440] sm:$0xff] }
  0x4e   :  { %3307 = vmatpush3.bf16.msra.mxu1 %v3304_v57  ;;  %3149 = vmatprep.subr.bf16.mxu0 %v3148_v63  ;;  %v2131_v57 = vld [vmem:[%s4472_s1 + $0x448] sm:$0xff] }
  0x4f   :  { %3309 = vmatprep.subr.bf16.mxu1 %v3308_v0  ;;  %2618 = vmatprep.mubr.f32.mxu0 %v3693_v29  ;;  %v3344_v59 = vpack.c.bf16 %v2131_v57, %v2130_v56  ;;  %v2070_v56 = vld [vmem:[%s4472_s1 + $0x260] sm:$0xff]  ;;  %v2071_v57 = vld [vmem:[%s4472_s1 + $0x268] sm:$0xff] }
  0x50   :  { %2823 = vmatprep.mubr.f32.mxu1 %v3693_v29 }
  0x51   :  { %3151 = vmatpush3.bf16.msra.mxu0 %v3148_v63  ;;  %v2132_v63 = vld [vmem:[%s4472_s1 + $0x450] sm:$0xff] }
  0x52   :  { %3311 = vmatpush3.bf16.msra.mxu1 %v3308_v0  ;;  %3153 = vmatprep.subr.bf16.mxu0 %v3152_v7  ;;  %v2133_v0 = vld [vmem:[%s4472_s1 + $0x458] sm:$0xff] }
  0x53   :  { %3313 = vmatprep.subr.bf16.mxu1 %v3312_v8  ;;  %v3348_v2 = vpack.c.bf16 %v2133_v0, %v2132_v63  ;;  %v2073_v63 = vld [vmem:[%s4472_s1 + $0x278] sm:$0xff]  ;;  %v2152_v0 = vld [vmem:[%s4472_s1 + $0x4f0] sm:$0xff] }
  0x55   :  { %3155 = vmatpush3.bf16.msra.mxu0 %v3152_v7  ;;  %v2135_v7 = vld [vmem:[%s4472_s1 + $0x468] sm:$0xff] }
  0x56   :  { %3315 = vmatpush3.bf16.msra.mxu1 %v3312_v8  ;;  %3157 = vmatprep.subr.bf16.mxu0 %v3156_v15  ;;  %v3352_v9 = vpack.c.bf16 %v2135_v7, %v2134_v6  ;;  %v1272_v6 = vld [vmem:[%s4474_s2 + $0x10] sm:$0xff]  ;;  %v1273_v7 = vld [vmem:[%s4474_s2 + $0x18] sm:$0xff] }
  0x57   :  { %3317 = vmatprep.subr.bf16.mxu1 %v3316_v16 }
  0x59   :  { %3159 = vmatpush3.bf16.msra.mxu0 %v3156_v15  ;;  %v2137_v15 = vld [vmem:[%s4472_s1 + $0x478] sm:$0xff] }
  0x5a   :  { %3319 = vmatpush3.bf16.msra.mxu1 %v3316_v16  ;;  %3161 = vmatprep.subr.bf16.mxu0 %v3160_v21  ;;  %v3196_v16 = vpack.c.bf16 %v2057_v12, %v2056_v10  ;;  %v3356_v17 = vpack.c.bf16 %v2137_v15, %v2136_v14  ;;  %v2156_v10 = vld [vmem:[%s4474_s2 + $0x50] sm:$0xff]  ;;  %v2157_v12 = vld [vmem:[%s4474_s2 + $0x58] sm:$0xff]  ;;  %v1274_v14 = vld [vmem:[%s4474_s2 + $0x20] sm:$0xff] }
  0x5b   :  { %3321 = vmatprep.subr.bf16.mxu1 %v3320_v22  ;;  %v3396_v15 = vpack.c.bf16 %v2157_v12, %v2156_v10 }
  0x5d   :  { %3163 = vmatpush3.bf16.msra.mxu0 %v3160_v21  ;;  %v2139_v21 = vld [vmem:[%s4472_s1 + $0x488] sm:$0xff] }
  0x5e   :  { %3323 = vmatpush3.bf16.msra.mxu1 %v3320_v22  ;;  %3165 = vmatprep.subr.bf16.mxu0 %v3164_v28  ;;  %v3200_v22 = vpack.c.bf16 %v2059_v19, %v2058_v18  ;;  %v3360_v23 = vpack.c.bf16 %v2139_v21, %v2138_v20  ;;  %v2158_v18 = vld [vmem:[%s4474_s2 + $0x60] sm:$0xff]  ;;  %v2159_v19 = vld [vmem:[%s4474_s2 + $0x68] sm:$0xff]  ;;  %v1276_v20 = vld [vmem:[%s4474_s2 + $0x30] sm:$0xff] }
  0x5f   :  { %3325 = vmatprep.subr.bf16.mxu1 %v3324_v30  ;;  %v3400_v21 = vpack.c.bf16 %v2159_v19, %v2158_v18  ;;  %v2180_v18 = vld [vmem:[%s4474_s2 + $0xc8] sm:$0xff] }
  0x61   :  { %3167 = vmatpush3.bf16.msra.mxu0 %v3164_v28  ;;  %v2141_v28 = vld [vmem:[%s4472_s1 + $0x498] sm:$0xff] }
  0x62   :  { %3327 = vmatpush3.bf16.msra.mxu1 %v3324_v30  ;;  %3169 = vmatprep.subr.bf16.mxu0 %v3168_v34  ;;  %v3204_v30 = vpack.c.bf16 %v2061_v25, %v2060_v24  ;;  %v3364_v31 = vpack.c.bf16 %v2141_v28, %v2140_v27  ;;  %v2160_v25 = vld [vmem:[%s4474_s2 + $0x70] sm:$0xff]  ;;  %v2161_v27 = vld [vmem:[%s4474_s2 + $0x78] sm:$0xf]  ;;  %v2168_v28 = vld [vmem:[%s4474_s2 + $0x80] sm:$0xff] }
  0x63   :  { %3329 = vmatprep.subr.bf16.mxu1 %v3328_v35 }
  0x64   :  { %2619 = vmatmul.mubr.f32.vlgmr.msra.gmra.mrb[0].mxu0 %v3759_v60 }
  0x65   :  { %3171 = vmatpush3.bf16.msra.mxu0 %v3168_v34  ;;  %2824 = vmatmul.mubr.f32.vlgmr.msra.gmra.mrb[0].mxu1 %v3759_v60  ;;  %v2143_v34 = vld [vmem:[%s4472_s1 + $0x4a8] sm:$0xff] }
  0x66   :  { %3331 = vmatpush3.bf16.msra.mxu1 %v3328_v35  ;;  %3173 = vmatprep.subr.bf16.mxu0 %v3172_v40  ;;  %v3208_v35 = vpack.c.bf16 %v2063_v32, %v2062_v26  ;;  %v3368_v36 = vpack.c.bf16 %v2143_v34, %v2142_v33 }
  0x67   :  { %3333 = vmatprep.subr.bf16.mxu1 %v3332_v41  ;;  %2621 = vmatprep.mubr.f32.mxu0 %v3778_v3 }
  0x68   :  { %2826 = vmatprep.mubr.f32.mxu1 %v3778_v3  ;;  %2622 = vmatmul.mubr.f32.gmra.mrb[2].mxu0 %v3783_v5 }
  0x69   :  { %3175 = vmatpush3.bf16.msra.mxu0 %v3172_v40  ;;  %2827 = vmatmul.mubr.f32.gmra.mrb[2].mxu1 %v3783_v5  ;;  %v2145_v40 = vld [vmem:[%s4472_s1 + $0x4b8] sm:$0xff] }
  0x6a   :  { %3335 = vmatpush3.bf16.msra.mxu1 %v3332_v41  ;;  %3177 = vmatprep.subr.bf16.mxu0 %v3176_v46  ;;  %v3212_v41 = vpack.c.bf16 %v2065_v38, %v2064_v37  ;;  %v3372_v43 = vpack.c.bf16 %v2145_v40, %v2144_v39 }
  0x6b   :  { %3337 = vmatprep.subr.bf16.mxu1 %v3336_v47  ;;  %2624 = vmatprep.mubr.f32.mxu0 %v3804_v11 }
  0x6c   :  { %2829 = vmatprep.mubr.f32.mxu1 %v3804_v11  ;;  %2625 = vmatmul.mubr.f32.gmra.mrb[4].mxu0 %v3809_v13 }
  0x6d   :  { %3179 = vmatpush3.bf16.msra.mxu0 %v3176_v46  ;;  %2830 = vmatmul.mubr.f32.gmra.mrb[4].mxu1 %v3809_v13  ;;  %v2146_v46 = vld [vmem:[%s4472_s1 + $0x4c0] sm:$0xff] }
  0x6e   :  { %3339 = vmatpush3.bf16.msra.mxu1 %v3336_v47  ;;  %3181 = vmatprep.subr.bf16.mxu0 %v3180_v52  ;;  %v2147_v47 = vld [vmem:[%s4472_s1 + $0x4c8] sm:$0xff] }
  0x6f   :  { %3341 = vmatprep.subr.bf16.mxu1 %v3340_v53  ;;  %2659 = vmatprep.mubr.f32.mxu0 %v3693_v29  ;;  %v2054_v29 = vld [vmem:[%s4472_s1 + $0x1e0] sm:$0xff]  ;;  %v3376_v49 = vpack.c.bf16 %v2147_v47, %v2146_v46 }
  0x70   :  { %2864 = vmatprep.mubr.f32.mxu1 %v3759_v60  ;;  %v3192_v8 = vpack.c.bf16 %v2055_v4, %v2054_v29 }
  0x71   :  { %3183 = vmatpush3.bf16.msra.mxu0 %v3180_v52  ;;  %v2148_v52 = vld [vmem:[%s4472_s1 + $0x4d0] sm:$0xff] }
  0x72   :  { %3343 = vmatpush3.bf16.msra.mxu1 %v3340_v53  ;;  %3185 = vmatprep.subr.bf16.mxu0 %v3184_v58  ;;  %v2149_v53 = vld [vmem:[%s4472_s1 + $0x4d8] sm:$0xff] }
  0x73   :  { %3345 = vmatprep.subr.bf16.mxu1 %v3344_v59  ;;  %v3380_v55 = vpack.c.bf16 %v2149_v53, %v2148_v52 }
  0x75   :  { %3187 = vmatpush3.bf16.msra.mxu0 %v3184_v58  ;;  %v2150_v58 = vld [vmem:[%s4472_s1 + $0x4e0] sm:$0xff] }
  0x76   :  { %3347 = vmatpush3.bf16.msra.mxu1 %v3344_v59  ;;  %3189 = vmatprep.subr.bf16.mxu0 %v3188_v1  ;;  %v3224_v59 = vpack.c.bf16 %v2071_v57, %v2070_v56  ;;  %v2171_v56 = vld [vmem:[%s4474_s2 + $0x98] sm:$0xff] }
  0x77   :  { %3349 = vmatprep.subr.bf16.mxu1 %v3348_v2 }
  0x79   :  { %3191 = vmatpush3.bf16.msra.mxu0 %v3188_v1  ;;  %v2153_v1 = vld [vmem:[%s4472_s1 + $0x4f8] sm:$0xff] }
  0x7a   :  { %3351 = vmatpush3.bf16.msra.mxu1 %v3348_v2  ;;  %3193 = vmatprep.subr.bf16.mxu0 %v3192_v8  ;;  %v3228_v2 = vpack.c.bf16 %v2073_v63, %v2072_v62  ;;  %v3388_v29 = vpack.c.bf16 %v2153_v1, %v2152_v0  ;;  %v2172_v1 = vld [vmem:[%s4474_s2 + $0xa0] sm:$0xff] }
  0x7b   :  { %3353 = vmatprep.subr.bf16.mxu1 %v3352_v9 }
  0x7d   :  { %3195 = vmatpush3.bf16.msra.mxu0 %v3192_v8 }
  0x7e   :  { %3355 = vmatpush3.bf16.msra.mxu1 %v3352_v9  ;;  %3197 = vmatprep.subr.bf16.mxu0 %v3196_v16  ;;  %v3414_v9 = vpack.c.bf16 %v1273_v7, %v1272_v6  ;;  %v2174_v7 = vld [vmem:[%s4474_s2 + $0xb0] sm:$0xff] }
  0x7f   :  { %3357 = vmatprep.subr.bf16.mxu1 %v3356_v17 }
  0x81   :  { %3199 = vmatpush3.bf16.msra.mxu0 %v3196_v16  ;;  %v1275_v16 = vld [vmem:[%s4474_s2 + $0x28] sm:$0xff] }
  0x82   :  { %3359 = vmatpush3.bf16.msra.mxu1 %v3356_v17  ;;  %3201 = vmatprep.subr.bf16.mxu0 %v3200_v22  ;;  %v3418_v17 = vpack.c.bf16 %v1275_v16, %v1274_v14 }
  0x83   :  { %3361 = vmatprep.subr.bf16.mxu1 %v3360_v23 }
  0x84   :  { %2660 = vmatmul.mubr.f32.vlgmr.msra.gmra.mrb[0].mxu0 %v3759_v60 }
  0x85   :  { %3203 = vmatpush3.bf16.msra.mxu0 %v3200_v22  ;;  %2865 = vmatmul.mubr.f32.vlgmr.msra.gmra.mrb[0].mxu1 %v3778_v3  ;;  %v1277_v22 = vld [vmem:[%s4474_s2 + $0x38] sm:$0xf] }
  0x86   :  { %3363 = vmatpush3.bf16.msra.mxu1 %v3360_v23  ;;  %3205 = vmatprep.subr.bf16.mxu0 %v3204_v30  ;;  %v3422_v24 = vpack.c.bf16 %v1277_v22, %v1276_v20  ;;  %v3586_v23 = vmov 0.0  }
  0x87   :  { %3365 = vmatprep.subr.bf16.mxu1 %v3364_v31  ;;  %2662 = vmatprep.mubr.f32.mxu0 %v3778_v3 }
  0x88   :  { %2867 = vmatprep.mubr.f32.mxu1 %v3783_v5  ;;  %2663 = vmatmul.mubr.f32.gmra.mrb[2].mxu0 %v3783_v5 }
  0x89   :  { %3207 = vmatpush3.bf16.msra.mxu0 %v3204_v30  ;;  %2868 = vmatmul.mubr.f32.gmra.mrb[2].mxu1 %v3804_v11  ;;  %v3404_v30 = vpack.c.bf16 %v2161_v27, %v2160_v25  ;;  %v2181_v25 = vld [vmem:[%s4474_s2 + $0xd0] sm:$0xff]  ;;  %v2182_v27 = vld [vmem:[%s4474_s2 + $0xd8] sm:$0xff] }
  0x8a   :  { %3367 = vmatpush3.bf16.msra.mxu1 %v3364_v31  ;;  %3209 = vmatprep.subr.bf16.mxu0 %v3208_v35  ;;  %v2169_v31 = vld [vmem:[%s4474_s2 + $0x88] sm:$0xff] }
  0x8b   :  { %3369 = vmatprep.subr.bf16.mxu1 %v3368_v36  ;;  %2665 = vmatprep.mubr.f32.mxu0 %v3804_v11  ;;  %v3428_v26 = vpack.c.bf16 %v2169_v31, %v2168_v28  ;;  %v2183_v31 = vld [vmem:[%s4474_s2 + $0xe0] sm:$0xff] }
  0x8c   :  { %2870 = vmatprep.mubr.f32.mxu1 %v3809_v13  ;;  %2666 = vmatmul.mubr.f32.gmra.mrb[4].mxu0 %v3809_v13 }
  0x8d   :  { %3211 = vmatpush3.bf16.msra.mxu0 %v3208_v35  ;;  %2871 = vmatmul.mubr.f32.gmra.mrb[4].mxu1 %v4138_v42 }
  0x8e   :  { %3371 = vmatpush3.bf16.msra.mxu1 %v3368_v36  ;;  %3213 = vmatprep.subr.bf16.mxu0 %v3212_v41 }
  0x8f   :  { %3373 = vmatprep.subr.bf16.mxu1 %v3372_v43  ;;  %2700 = vmatprep.mubr.f32.mxu0 %v3759_v60 }
  0x90   :  { %2905 = vmatprep.mubr.f32.mxu1 %v3759_v60  ;;  %v2151_v60 = vld [vmem:[%s4472_s1 + $0x4e8] sm:$0xff] }
  0x91   :  { %3215 = vmatpush3.bf16.msra.mxu0 %v3212_v41  ;;  %v3384_v61 = vpack.c.bf16 %v2151_v60, %v2150_v58 }
  0x92   :  { %3375 = vmatpush3.bf16.msra.mxu1 %v3372_v43  ;;  %3217 = vmatprep.subr.bf16.mxu0 %v3216_v48 }
  0x93   :  { %3377 = vmatprep.subr.bf16.mxu1 %v3376_v49 }
  0x95   :  { %3219 = vmatpush3.bf16.msra.mxu0 %v3216_v48 }
  0x96   :  { %3379 = vmatpush3.bf16.msra.mxu1 %v3376_v49  ;;  %3221 = vmatprep.subr.bf16.mxu0 %v3220_v54 }
  0x97   :  { %3381 = vmatprep.subr.bf16.mxu1 %v3380_v55 }
  0x99   :  { %3223 = vmatpush3.bf16.msra.mxu0 %v3220_v54 }
  0x9a   :  { %3383 = vmatpush3.bf16.msra.mxu1 %v3380_v55  ;;  %3225 = vmatprep.subr.bf16.mxu0 %v3224_v59  ;;  %v2170_v55 = vld [vmem:[%s4474_s2 + $0x90] sm:$0xff] }
  0x9b   :  { %3385 = vmatprep.subr.bf16.mxu1 %v3384_v61  ;;  %v3432_v62 = vpack.c.bf16 %v2171_v56, %v2170_v55  ;;  %v3585_v55 = vmov 0.0|0.0   ;;  %v1744_v56 = vld [vmem:[%s4475_s3 + $0x10] sm:$0xf] }
  0x9d   :  { %3227 = vmatpush3.bf16.msra.mxu0 %v3224_v59 }
  0x9e   :  { %3387 = vmatpush3.bf16.msra.mxu1 %v3384_v61  ;;  %3229 = vmatprep.subr.bf16.mxu0 %v3228_v2 }
  0x9f   :  { %3389 = vmatprep.subr.bf16.mxu1 %v3388_v29 }
  0xa1   :  { %3231 = vmatpush3.bf16.msra.mxu0 %v3228_v2  ;;  %v2173_v2 = vld [vmem:[%s4474_s2 + $0xa8] sm:$0xff] }
  0xa2   :  { %3391 = vmatpush3.bf16.msra.mxu1 %v3388_v29 }
  0xa4   :  { %2701 = vmatmul.mubr.f32.vlgmr.msra.gmra.mrb[0].mxu0 %v3778_v3 }
  0xa5   :  { %2906 = vmatmul.mubr.f32.vlgmr.msra.gmra.mrb[0].mxu1 %v3778_v3  ;;  %2703 = vmatprep.mubr.f32.mxu0 %v3783_v5  ;;  %v1270_v3 = vld [vmem:[%s4474_s2] sm:$0xff] }
  0xa6   :  { %2908 = vmatprep.mubr.f32.mxu1 %v3783_v5  ;;  %v1271_v5 = vld [vmem:[%s4474_s2 + $0x8] sm:$0xff] }
  0xa7   :  { %v3410_v4 = vpack.c.bf16 %v1271_v5, %v1270_v3 }
  0xa8   :  { %2704 = vmatmul.mubr.f32.gmra.mrb[2].mxu0 %v3804_v11 }
  0xa9   :  { %2909 = vmatmul.mubr.f32.gmra.mrb[2].mxu1 %v3804_v11  ;;  %2706 = vmatprep.mubr.f32.mxu0 %v3809_v13  ;;  %v2154_v11 = vld [vmem:[%s4474_s2 + $0x40] sm:$0xff] }
  0xaa   :  { %2911 = vmatprep.mubr.f32.mxu1 %v3809_v13  ;;  %v2155_v13 = vld [vmem:[%s4474_s2 + $0x48] sm:$0xff]  ;;  %3411 = vmatprep.subr.bf16.mxu0 %v3410_v4 }
  0xab   :  { %v3392_v8 = vpack.c.bf16 %v2155_v13, %v2154_v11  ;;  %3413 = vmatpush3.bf16.msra.mxu0 %v3410_v4  ;;  %v3436_v4 = vpack.c.bf16 %v2173_v2, %v2172_v1  ;;  %v1823_v1 = vld [vmem:[%s4476_s4] sm:$0xff]  ;;  %v1824_v2 = vld [vmem:[%s4476_s4 + $0x8] sm:$0xff] }
  0xac   :  { %2707 = vmatmul.mubr.f32.gmra.mrb[4].mxu0 %v4138_v42  ;;  %3415 = vmatprep.subr.bf16.mxu0 %v3414_v9 }
  0xad   :  { %2912 = vmatmul.mubr.f32.gmra.mrb[4].mxu1 %v4138_v42  ;;  %3393 = vmatprep.subr.bf16.mxu1 %v3392_v8 }
  0xae   :  { %3395 = vmatpush3.bf16.msra.mxu1 %v3392_v8  ;;  %v2175_v8 = vld [vmem:[%s4474_s2 + $0xb8] sm:$0xf] }
  0xaf   :  { %3417 = vmatpush3.bf16.msra.mxu0 %v3414_v9  ;;  %3397 = vmatprep.subr.bf16.mxu1 %v3396_v15  ;;  %v3440_v14 = vpack.c.bf16 %v2175_v8, %v2174_v7  ;;  %v1828_v7 = vld [vmem:[%s4476_s4 + $0x28] sm:$0xff] }
  0xb0   :  { %3419 = vmatprep.subr.bf16.mxu0 %v3418_v17 }
  0xb2   :  { %3399 = vmatpush3.bf16.msra.mxu1 %v3396_v15 }
  0xb3   :  { %3421 = vmatpush3.bf16.msra.mxu0 %v3418_v17  ;;  %3401 = vmatprep.subr.bf16.mxu1 %v3400_v21  ;;  %v2179_v17 = vld [vmem:[%s4474_s2 + $0xc0] sm:$0xff] }
  0xb4   :  { %3424 = vmatprep.subr.msk.bf16.mxu0 %vm4247_vm2, %v3422_v24  ;;  %v3446_v22 = vpack.c.bf16 %v2180_v18, %v2179_v17  ;;  %v1833_v17 = vld [vmem:[%s4476_s4 + $0x50] sm:$0xff]  ;;  %v1834_v18 = vld [vmem:[%s4476_s4 + $0x58] sm:$0xff] }
  0xb6   :  { %3403 = vmatpush3.bf16.msra.mxu1 %v3400_v21 }
  0xb7   :  { %3427 = vmatpush3.bf16.msk.msra.mxu0 %vm4247_vm2, %v3422_v24  ;;  %3406 = vmatprep.subr.msk.bf16.mxu1 %vm4247_vm2, %v3404_v30 }
  0xb8   :  { %3429 = vmatprep.subr.bf16.mxu0 %v3428_v26 }
  0xba   :  { %3409 = vmatpush3.bf16.msk.msra.mxu1 %vm4247_vm2, %v3404_v30  ;;  %v3450_v30 = vpack.c.bf16 %v2182_v27, %v2181_v25  ;;  %v1838_v25 = vld [vmem:[%s4476_s4 + $0x78] sm:$0xff] }
  0xbb   :  { %3482 = vmatprep.subr.bf16.mxu1 %v3585_v55 }
 0x177   :  { %v2702_v32 = vpop.f32.mrb[0].mxu0 }
 0x178   :  { %v2907_v33 = vpop.f32.mrb[0].mxu1  ;;  %628 = vrot.lane.b32.xlu1 %v2702_v32, %s3584_s28  ;;  %v585_v34 = vpop.f32.mrb[1].mxu0 }
 0x179   :  { %v1193_v35 = vpop.f32.mrb[1].mxu1  ;;  %626 = vrot.lane.b32.xlu0 %v585_v34, %s3584_s28 }
 0x17b   :  { %v2705_v36 = vpop.f32.mrb[2].mxu0 }
 0x17c   :  { %v2910_v37 = vpop.f32.mrb[2].mxu1  ;;  %1236 = vrot.lane.b32.xlu1 %v2907_v33, %s3584_s28  ;;  %v595_v38 = vpop.f32.mrb[3].mxu0 }
 0x17d   :  { %v1203_v39 = vpop.f32.mrb[3].mxu1  ;;  %1234 = vrot.lane.b32.xlu0 %v1193_v35, %s3584_s28 }
 0x17f   :  { %v4271_v40 = vpop.f32.mrb[4].mxu0 }
 0x180   :  { %v4273_v41 = vpop.f32.mrb[4].mxu1  ;;  %1238 = vrot.lane.b32.xlu1 %v1203_v39, %s3584_s28  ;;  %v605_v42 = vpop.f32.mrb[5].mxu0 }
 0x181   :  { %v1213_v43 = vpop.f32.mrb[5].mxu1  ;;  %630 = vrot.lane.b32.xlu0 %v595_v38, %s3584_s28 }
 0x184   :  { %1240 = vrot.lane.b32.xlu1 %v2910_v37, %s3584_s28 }
 0x185   :  { %632 = vrot.lane.b32.xlu0 %v2705_v36, %s3584_s28 }
 0x188   :  { %1242 = vrot.lane.b32.xlu1 %v1213_v43, %s3584_s28 }
 0x189   :  { %634 = vrot.lane.b32.xlu0 %v605_v42, %s3584_s28 }
 0x18c   :  { %1244 = vrot.lane.b32.xlu1 %v4273_v41, %s3584_s28 }
 0x18d   :  { %636 = vrot.lane.b32.xlu0 %v4271_v40, %s3584_s28 }
 0x1ea   :  { %v629_v44 = vpop.permute.xlu1 %628 }
 0x1eb   :  { %v627_v45 = vpop.permute.xlu0 %626  ;;  %v645_v47 = vmax.f32 %v2702_v32, %v629_v44  ;;  %v2195_v44 = vld [vmem:[%s4474_s2 + $0x128] sm:$0xff] }
 0x1ec   :  { %v644_v50 = vmax.f32 %v585_v34, %v627_v45  ;;  %v2186_v34 = vld [vmem:[%s4474_s2 + $0xf8] sm:$0xf] }
 0x1ee   :  { %v1237_v46 = vpop.permute.xlu1 %1236 }
 0x1ef   :  { %v1253_v48 = vmax.f32 %v2907_v33, %v1237_v46  ;;  %v1235_v49 = vpop.permute.xlu0 %1234  ;;  %v2185_v33 = vld [vmem:[%s4474_s2 + $0xf0] sm:$0xff] }
 0x1f0   :  { %v1252_v51 = vmax.f32 %v1193_v35, %v1235_v49  ;;  %v3458_v35 = vpack.c.bf16 %v2186_v34, %v2185_v33  ;;  %v2196_v46 = vld [vmem:[%s4474_s2 + $0x130] sm:$0xff] }
 0x1f1   :  { %v1259_v52 = vmax.f32 %v645_v47, %v1253_v48  ;;  %v2197_v47 = vld [vmem:[%s4474_s2 + $0x138] sm:$0xf]  ;;  %v1912_v34 = vld [vmem:[%s4477_s5 + $0x10] sm:$0xff] }
 0x1f2   :  { %v1258_v53 = vmax.f32 %v644_v50, %v1252_v51  ;;  %v1239_v54 = vpop.permute.xlu1 %1238  ;;  %v3476_v48 = vpack.c.bf16 %v2197_v47, %v2196_v46 }
 0x1f3   :  { %v1265_v57 = vmax.f32 %v1259_v52, 0.0  ;;  %v1254_v58 = vmax.f32 %v1203_v39, %v1239_v54  ;;  %v631_v60 = vpop.permute.xlu0 %630  ;;  %v2192_v39 = vld [vmem:[%s4474_s2 + $0x110] sm:$0xff]  ;;  %v1742_v52 = vld [vmem:[%s4475_s3] sm:$0xff] }
 0x1f4   :  { %v1264_v59 = vmax.f32 %v1258_v53, 0.0  ;;  %v646_v61 = vmax.f32 %v595_v38, %v631_v60  ;;  %v1743_v53 = vld [vmem:[%s4475_s3 + $0x8] sm:$0xff] }
 0x1f5   :  { %2930 = vmatprep.mubr.msk.f32.mxu1 %vm1287_vm3, %v1265_v57  ;;  %v3483_v54 = vpack.c.bf16 %v1743_v53, %v1742_v52 }
 0x1f6   :  { %v1260_v63 = vmax.f32 %v646_v61, %v1254_v58  ;;  %v1241_v0 = vpop.permute.xlu1 %1240  ;;  %2949 = vmatprep.mubr.msk.f32.mxu0 %vm1287_vm3, %v1264_v59 }
 0x1f7   :  { %v1255_v29 = vmax.f32 %v2910_v37, %v1241_v0  ;;  %2950 = vmatmul.mubr.msk.f32.vlgmr.msra.gmra.mrb[6].mxu0 %vm1287_vm3, %v1265_v57  ;;  %v633_v3 = vpop.permute.xlu0 %632  ;;  %v2191_v37 = vld [vmem:[%s4474_s2 + $0x108] sm:$0xff] }
 0x1f8   :  { %v1266_v5 = vmax.f32 %v1260_v63, 0.0  ;;  %3431 = vmatpush3.bf16.msra.mxu0 %v3428_v26  ;;  %v647_v11 = vmax.f32 %v2705_v36, %v633_v3  ;;  %v2184_v26 = vld [vmem:[%s4474_s2 + $0xe8] sm:$0xff]  ;;  %v2190_v36 = vld [vmem:[%s4474_s2 + $0x100] sm:$0xff]  ;;  %v3486_v3 = vpack.c.bf16 %v1824_v2, %v1823_v1 }
 0x1f9   :  { %3433 = vmatprep.subr.bf16.mxu0 %v3432_v62  ;;  %v3454_v32 = vpack.c.bf16 %v2184_v26, %v2183_v31  ;;  %v3464_v38 = vpack.c.bf16 %v2191_v37, %v2190_v36  ;;  %v1914_v37 = vld [vmem:[%s4477_s5 + $0x20] sm:$0xff] }
 0x1fa   :  { %v1261_v13 = vmax.f32 %v647_v11, %v1255_v29  ;;  %v1243_v6 = vpop.permute.xlu1 %1242  ;;  %2931 = vmatmul.mubr.msk.f32.vlgmr.msra.gmra.mrb[6].mxu1 %vm1287_vm3, %v1266_v5  ;;  %2968 = vmatprep.mubr.msk.f32.mxu0 %vm1287_vm3, %v1266_v5  ;;  %v1825_v11 = vld [vmem:[%s4476_s4 + $0x10] sm:$0xff] }
 0x1fb   :  { %v1256_v9 = vmax.f32 %v1213_v43, %v1243_v6  ;;  %v635_v10 = vpop.permute.xlu0 %634  ;;  %v2194_v43 = vld [vmem:[%s4474_s2 + $0x120] sm:$0xff]  ;;  %3484 = vmatpush3.bf16.msra.mxu1 %v3483_v54  ;;  %3015 = vmatprep.mubr.msk.f32.mxu1 %vm3587_vm4, %v3586_v23 }
 0x1fc   :  { %3435 = vmatpush3.bf16.msra.mxu0 %v3432_v62  ;;  %v648_v12 = vmax.f32 %v605_v42, %v635_v10  ;;  %v1267_v28 = vmax.f32 %v1261_v13, 0.0  ;;  %v3472_v45 = vpack.c.bf16 %v2195_v44, %v2194_v43  ;;  %3013 = vmatprep.subr.mxu1 %v3586_v23  ;;  %v1827_v6 = vld [vmem:[%s4476_s4 + $0x20] sm:$0xff]  ;;  %v1830_v10 = vld [vmem:[%s4476_s4 + $0x38] sm:$0xff] }
 0x1fd   :  { %3437 = vmatprep.subr.bf16.mxu0 %v3436_v4  ;;  %v3492_v8 = vpack.c.bf16 %v1828_v7, %v1827_v6 }
 0x1fe   :  { %v1262_v15 = vmax.f32 %v648_v12, %v1256_v9  ;;  %v1245_v16 = vpop.permute.xlu1 %1244  ;;  %v1829_v9 = vld [vmem:[%s4476_s4 + $0x30] sm:$0xff] }
 0x1ff   :  { %v1257_v19 = vmax.f32 %v4273_v41, %v1245_v16  ;;  %v637_v20 = vpop.permute.xlu0 %636  ;;  %3014 = vmatpush3.msk.msra.mxu1 %vm1294_vm0, %v1744_v56  ;;  %v3495_v12 = vpack.c.bf16 %v1830_v10, %v1829_v9 }
 0x200   :  { %3439 = vmatpush3.bf16.msra.mxu0 %v3436_v4  ;;  %v649_v21 = vmax.f32 %v4271_v40, %v637_v20  ;;  %v2193_v40 = vld [vmem:[%s4474_s2 + $0x118] sm:$0xff]  ;;  %v1268_v41 = vmax.f32 %v1262_v15, 0.0  ;;  %3485 = vmatprep.subr.bf16.mxu1 %v3585_v55  ;;  %v1832_v15 = vld [vmem:[%s4476_s4 + $0x48] sm:$0xff]  ;;  %v1835_v20 = vld [vmem:[%s4476_s4 + $0x60] sm:$0xff] }
 0x201   :  { %3442 = vmatprep.subr.msk.bf16.mxu0 %vm4247_vm2, %v3440_v14  ;;  %v3468_v42 = vpack.c.bf16 %v2193_v40, %v2192_v39  ;;  %v1826_v4 = vld [vmem:[%s4476_s4 + $0x18] sm:$0xff]  ;;  %v1916_v40 = vld [vmem:[%s4477_s5 + $0x30] sm:$0xff] }
 0x202   :  { %v1263_v24 = vmax.f32 %v649_v21, %v1257_v19  ;;  %v3489_v13 = vpack.c.bf16 %v1826_v4, %v1825_v11  ;;  %v3501_v19 = vpack.c.bf16 %v1834_v18, %v1833_v17  ;;  %v1836_v21 = vld [vmem:[%s4476_s4 + $0x68] sm:$0xff] }
 0x204   :  { %3445 = vmatpush3.bf16.msk.msra.mxu0 %vm4247_vm2, %v3440_v14  ;;  %v1269_v49 = vmax.f32 %v1263_v24, 0.0  ;;  %v1831_v14 = vld [vmem:[%s4476_s4 + $0x40] sm:$0xff]  ;;  %v1837_v24 = vld [vmem:[%s4476_s4 + $0x70] sm:$0xff] }
 0x205   :  { %3447 = vmatprep.subr.bf16.mxu0 %v3446_v22  ;;  %v3498_v16 = vpack.c.bf16 %v1832_v15, %v1831_v14  ;;  %v3507_v27 = vpack.c.bf16 %v1838_v25, %v1837_v24 }
 0x207   :  { %2969 = vmatmul.mubr.msk.f32.vlgmr.msra.gmra.mrb[6].mxu0 %vm1287_vm3, %v1267_v28 }
 0x208   :  { %3449 = vmatpush3.bf16.msra.mxu0 %v3446_v22  ;;  %2987 = vmatprep.mubr.msk.f32.mxu0 %vm1287_vm3, %v1267_v28  ;;  %v3504_v22 = vpack.c.bf16 %v1836_v21, %v1835_v20  ;;  %v1910_v28 = vld [vmem:[%s4477_s5] sm:$0xff] }
 0x209   :  { %3451 = vmatprep.subr.bf16.mxu0 %v3450_v30 }
 0x20c   :  { %3453 = vmatpush3.bf16.msra.mxu0 %v3450_v30  ;;  %v1911_v30 = vld [vmem:[%s4477_s5 + $0x8] sm:$0xff] }
 0x20d   :  { %3455 = vmatprep.subr.bf16.mxu0 %v3454_v32  ;;  %v3510_v26 = vpack.c.bf16 %v1911_v30, %v1910_v28 }
 0x210   :  { %3457 = vmatpush3.bf16.msra.mxu0 %v3454_v32 }
 0x211   :  { %3460 = vmatprep.subr.msk.bf16.mxu0 %vm4247_vm2, %v3458_v35 }
 0x214   :  { %3463 = vmatpush3.bf16.msk.msra.mxu0 %vm4247_vm2, %v3458_v35  ;;  %v1913_v35 = vld [vmem:[%s4477_s5 + $0x18] sm:$0xff] }
 0x215   :  { %3465 = vmatprep.subr.bf16.mxu0 %v3464_v38  ;;  %v3513_v36 = vpack.c.bf16 %v1913_v35, %v1912_v34 }
 0x217   :  { %2988 = vmatmul.mubr.msk.f32.vlgmr.msra.gmra.mrb[6].mxu0 %vm1287_vm3, %v1268_v41 }
 0x218   :  { %3467 = vmatpush3.bf16.msra.mxu0 %v3464_v38  ;;  %3006 = vmatprep.mubr.msk.f32.mxu0 %vm1287_vm3, %v1268_v41  ;;  %v1915_v38 = vld [vmem:[%s4477_s5 + $0x28] sm:$0xff]  ;;  %v1917_v41 = vld [vmem:[%s4477_s5 + $0x38] sm:$0xff] }
 0x219   :  { %3469 = vmatprep.subr.bf16.mxu0 %v3468_v42  ;;  %v3516_v39 = vpack.c.bf16 %v1915_v38, %v1914_v37 }
 0x21c   :  { %3471 = vmatpush3.bf16.msra.mxu0 %v3468_v42  ;;  %v3519_v42 = vpack.c.bf16 %v1917_v41, %v1916_v40 }
 0x21d   :  { %3473 = vmatprep.subr.bf16.mxu0 %v3472_v45 }
 0x220   :  { %3475 = vmatpush3.bf16.msra.mxu0 %v3472_v45 }
 0x221   :  { %3478 = vmatprep.subr.msk.bf16.mxu0 %vm4247_vm2, %v3476_v48 }
 0x224   :  { %3481 = vmatpush3.bf16.msk.msra.mxu0 %vm4247_vm2, %v3476_v48 }
 0x227   :  { %3007 = vmatmul.mubr.msk.f32.vlgmr.msra.gmra.mrb[6].mxu0 %vm1287_vm3, %v1269_v49 }
 0x2cd   :  { %v2932_v50 = vpop.f32.mrb[6].mxu1 }
 0x2ce   :  { %v1364_v51 = vpop.f32.mrb[7].mxu1 }
 0x2fa   :  { %v3008_v57 = vpop.f32.mrb[6].mxu0 }
 0x2fb   :  { %v3521_v58 = vadd.f32 %v3008_v57, %v2932_v50  ;;  %v1719_v60 = vpop.f32.mrb[7].mxu0 }
 0x2fc   :  { %v3522_v59 = vadd.f32 %v1719_v60, %v1364_v51 }
 0x2fd   :  { %1734 = vrot.lane.b32.xlu1 %v3521_v58, %s3588_s26 }
 0x2fe   :  { %1732 = vrot.lane.b32.xlu0 %v3522_v59, %s3588_s26 }
 0x36f   :  { %v1735_v61 = vpop.permute.xlu1 %1734 }
 0x370   :  { %v1739_v62 = vmax.f32 %v3521_v58, %v1735_v61  ;;  %v1733_v63 = vpop.permute.xlu0 %1732 }
 0x371   :  { %v1738_v0 = vmax.f32 %v3522_v59, %v1733_v63 }
 0x373   :  { %v1740_v29 = vmax.f32 %v1738_v0, %v1739_v62 }
 0x375   :  { %v1741_v5 = vmax.f32 %v1740_v29, 0.0 }
 0x377   :  { %3016 = vmatmul.mubr.msk.f32.vlgmr.msra.gmra.mrb[8].mxu1 %vm1745_vm5, %v1741_v5 }
 0x378   :  { %3487 = vmatpush3.bf16.msra.mxu1 %v3486_v3  ;;  %3050 = vmatprep.mubr.msk.f32.mxu1 %vm3587_vm4, %v3586_v23 }
 0x379   :  { %3488 = vmatprep.subr.bf16.mxu1 %v3585_v55 }
 0x37c   :  { %3490 = vmatpush3.bf16.msra.mxu1 %v3489_v13 }
 0x37d   :  { %3491 = vmatprep.subr.bf16.mxu1 %v3585_v55 }
 0x380   :  { %3493 = vmatpush3.bf16.msra.mxu1 %v3492_v8 }
 0x381   :  { %3494 = vmatprep.subr.bf16.mxu1 %v3585_v55 }
 0x384   :  { %3496 = vmatpush3.bf16.msra.mxu1 %v3495_v12 }
 0x385   :  { %3497 = vmatprep.subr.bf16.mxu1 %v3585_v55 }
 0x388   :  { %3499 = vmatpush3.bf16.msra.mxu1 %v3498_v16 }
 0x389   :  { %3500 = vmatprep.subr.bf16.mxu1 %v3585_v55 }
 0x38c   :  { %3502 = vmatpush3.bf16.msra.mxu1 %v3501_v19 }
 0x38d   :  { %3503 = vmatprep.subr.bf16.mxu1 %v3585_v55 }
 0x390   :  { %3505 = vmatpush3.bf16.msra.mxu1 %v3504_v22 }
 0x391   :  { %3506 = vmatprep.subr.bf16.mxu1 %v3585_v55 }
 0x394   :  { %3508 = vmatpush3.bf16.msra.mxu1 %v3507_v27 }
 0x395   :  { %3509 = vmatprep.subr.bf16.mxu1 %v3585_v55 }
 0x44a   :  { %v1818_v31 = vpop.f32.mrb[8].mxu1 }
 0x44b   :  { %v1822_v32 = vmax.f32 %v1818_v31, 0.0  ;;  %v3017_v33 = vpop.f32.mrb[9].mxu1 }
 0x44d   :  { %3051 = vmatmul.mubr.f32.vlgmr.msra.gmra.mrb[10].mxu1 %v1822_v32 }
 0x44e   :  { %3511 = vmatpush3.bf16.msra.mxu1 %v3510_v26  ;;  %3069 = vmatprep.mubr.msk.f32.mxu1 %vm3587_vm4, %v3586_v23 }
 0x44f   :  { %3512 = vmatprep.subr.bf16.mxu1 %v3585_v55 }
 0x452   :  { %3514 = vmatpush3.bf16.msra.mxu1 %v3513_v36 }
 0x453   :  { %3515 = vmatprep.subr.bf16.mxu1 %v3585_v55 }
 0x456   :  { %3517 = vmatpush3.bf16.msra.mxu1 %v3516_v39 }
 0x457   :  { %3518 = vmatprep.subr.bf16.mxu1 %v3585_v55 }
 0x45a   :  { %3520 = vmatpush3.bf16.msra.mxu1 %v3519_v42 }
 0x520   :  { %v1905_v43 = vpop.f32.mrb[10].mxu1 }
 0x521   :  { %v1909_v44 = vmax.f32 %v1905_v43, 0.0  ;;  %v3052_v45 = vpop.f32.mrb[11].mxu1 }
 0x523   :  { %3070 = vmatmul.mubr.msk.f32.vlgmr.msra.gmra.mrb[12].mxu1 %vm1918_vm6, %v1909_v44 }
 0x5f6   :  { %v1988_v46 = vpop.f32.mrb[12].mxu1 }
 0x5f7   :  { %1993 = vst.msk [vmem:[%s4478_s6] sm:$0xff] %vm1992_vm7, %v1988_v46  ;;  %v3071_v47 = vpop.f32.mrb[13].mxu1 }

</bundles_post_ra>
